<compile_context>
chip_gen: v7x
topology: tpu7x:2x2x1
jax: 0.10.0
libtpu: 0.0.40
codegen_flags: <defaults>
</compile_context>

<pallas_src>
import jax
import jax.numpy as jnp
from jax import lax
from jax.experimental import pallas as pl
from jax.experimental.pallas import tpu as pltpu

NEG_SLOPE = 0.01  # nn.LeakyReLU default negative_slope


def _leaky(x):
    return jnp.where(x > 0, x, NEG_SLOPE * x)


def _make_resblock_kernel(W):
    """Returns the fused kernel body, closed over the static image width W."""

    def kernel(gate_ref, x_ref, w1_ref, b1_ref, w2_ref, b2_ref, out_ref):
        # Per grid step (Nb images, M = Nb*H*W, K3 = 3*C):
        #   gate_ref : (9, M, 1)  f32   {0,1} border gate per output pixel & tap
        #   x_ref    : (M, C)     f32   flat activations (lane-dense)
        #   w*_ref   : (3, K3, C) bf16  weights, row = dy, K ordered (dx, cin)
        #   b*_ref   : (1, C)     f32
        #   out_ref  : (M, C)     f32
        M = x_ref.shape[0]

        # Hoist the (M, 1) gates once; reused by both convolutions.
        gates = [gate_ref[t] for t in range(9)]

        x32 = x_ref[...]                       # f32; also reused for residual

        def conv3x3(src_f32, w_ref):
            acc = None
            for dy in range(3):
                parts = []
                for dx in range(3):
                    # v[i] = src[i + (dy-1)*W + (dx-1)] ; wrap-around (padding
                    # and image-boundary crossings) is zeroed by the gate.
                    shift = ((1 - dy) * W + (1 - dx)) % M
                    if shift == 0:
                        v = src_f32
                    else:
                        v = pltpu.roll(src_f32, shift=shift, axis=0)   # XLU
                    if (dy, dx) != (1, 1):
                        v = v * gates[dy * 3 + dx]                     # VPU
                    parts.append(v.astype(jnp.bfloat16))
                patch = jnp.concatenate(parts, axis=1)                 # (M, 3C)
                d = jnp.dot(patch, w_ref[dy],
                            preferred_element_type=jnp.float32)        # MXU
                acc = d if acc is None else acc + d
            return acc                                                 # (M, C) f32

        h = _leaky(conv3x3(x32, w1_ref) + b1_ref[...])
        o = conv3x3(h, w2_ref) + b2_ref[...]
        out_ref[...] = _leaky(o + x32)

    return kernel


def _build_tap_gates(nb, H, W):
    """(9, nb*H*W, 1) f32 {0,1} multipliers: 0 where a 3x3 tap falls in the
    zero padding of its own image (this also kills roll wrap-around between
    images / buffer ends)."""
    y = jnp.arange(H, dtype=jnp.int32).reshape(1, H, 1)
    x = jnp.arange(W, dtype=jnp.int32).reshape(1, 1, W)
    gates = []
    for dy in range(3):
        for dx in range(3):
            ok = jnp.ones((1, H, W), dtype=bool)
            if dy == 0:
                ok = ok & (y > 0)
            if dy == 2:
                ok = ok & (y < H - 1)
            if dx == 0:
                ok = ok & (x > 0)
            if dx == 2:
                ok = ok & (x < W - 1)
            ok = jnp.broadcast_to(ok, (nb, H, W)).reshape(nb * H * W, 1)
            gates.append(ok)
    return jnp.stack(gates, axis=0).astype(jnp.float32)


def _pick_images_per_step(N, HW, m_cap=2048):
    """Largest Nb that divides N, keeps >= 2 grid steps (two v7x TensorCores)
    and bounds the per-step matmul M (working set)."""
    if N <= 1:
        return 1
    cands = [nb for nb in range(1, N // 2 + 1)
             if N % nb == 0 and nb * HW <= m_cap]
    return max(cands) if cands else 1


def resblock_forward_nhwc(x, w1, b1, w2, b2, images_per_step=None):
    """x: (N, H, W, C) f32.  w*: (3, 3, C, C) HWIO.  b*: (C,)."""
    N, H, W, C = x.shape
    HW = H * W
    nb = (images_per_step if images_per_step is not None
          else _pick_images_per_step(N, HW))
    assert N % nb == 0, (N, nb)
    M = nb * HW

    x2d = x.reshape(N * HW, C)                           # free reshape in XLA
    w1r = w1.reshape(3, 3 * C, C).astype(jnp.bfloat16)   # K ordered (dx, cin)
    w2r = w2.reshape(3, 3 * C, C).astype(jnp.bfloat16)
    b1r = b1.reshape(1, C).astype(jnp.float32)
    b2r = b2.reshape(1, C).astype(jnp.float32)
    gates = _build_tap_gates(nb, H, W)                   # (9, M, 1) f32

    out2d = pl.pallas_call(
        _make_resblock_kernel(W),
        out_shape=jax.ShapeDtypeStruct((N * HW, C), jnp.float32),
        grid_spec=pltpu.PrefetchScalarGridSpec(
            num_scalar_prefetch=0,
            grid=(N // nb,),
            in_specs=[
                # Constant block index => fetched once, stays VMEM-resident.
                pl.BlockSpec((9, M, 1), lambda n: (0, 0, 0)),       # gates
                pl.BlockSpec((M, C), lambda n: (n, 0)),             # x rows
                # TODO(synk): on v7x, pipeline_mode=pl.Buffered(1) on the
                # constant weight blocks would drop their redundant 2nd buffer.
                pl.BlockSpec((3, 3 * C, C), lambda n: (0, 0, 0)),   # w1
                pl.BlockSpec((1, C), lambda n: (0, 0)),             # b1
                pl.BlockSpec((3, 3 * C, C), lambda n: (0, 0, 0)),   # w2
                pl.BlockSpec((1, C), lambda n: (0, 0)),             # b2
            ],
            out_specs=pl.BlockSpec((M, C), lambda n: (n, 0)),
        ),
        compiler_params=pltpu.CompilerParams(
            dimension_semantics=("parallel",)),
    )(gates, x2d, w1r, b1r, w2r, b2r)
    return out2d.reshape(N, H, W, C)


def resblock_forward(x_nchw, w1, b1, w2, b2):
    """PyTorch-layout entry point: x (N, C, H, W) f32."""
    # TODO(synk): if the surrounding model already runs NHWC, call
    # resblock_forward_nhwc directly and drop these two transpose passes
    # (each is a full HBM read+write comparable to the kernel at these shapes).
    x = jnp.transpose(x_nchw, (0, 2, 3, 1))
    out = resblock_forward_nhwc(x, w1, b1, w2, b2)
    return jnp.transpose(out, (0, 3, 1, 2))


def resblock_reference(x_nchw, w1, b1, w2, b2):
    """Pure-JAX f32 reference (lax conv) for correctness check."""
    x = jnp.transpose(x_nchw, (0, 2, 3, 1))
    dn = ("NHWC", "HWIO", "NHWC")
    h = lax.conv_general_dilated(x, w1, (1, 1), "SAME", dimension_numbers=dn,
                                 precision=lax.Precision.HIGHEST) + b1
    h = _leaky(h)
    o = lax.conv_general_dilated(h, w2, (1, 1), "SAME", dimension_numbers=dn,
                                 precision=lax.Precision.HIGHEST) + b2
    o = _leaky(o + x)
    return jnp.transpose(o, (0, 3, 1, 2))


if __name__ == "__main__":
    # Small shapes consistent with the module (num_filters kept small;
    # channels = 128 so channels map exactly onto the 128-lane axis).
    N, C, H, W = 2, 128, 8, 8

    key = jax.random.PRNGKey(0)
    kx, k1, k2, k3, k4 = jax.random.split(key, 5)

    x = jax.random.normal(kx, (N, C, H, W), dtype=jnp.float32)

    # Deterministic init mimicking PyTorch conv default (uniform, fan_in = C*9).
    bound = 1.0 / jnp.sqrt(jnp.float32(C * 9))
    w1 = jax.random.uniform(k1, (3, 3, C, C), jnp.float32, -bound, bound)
    b1 = jax.random.uniform(k2, (C,), jnp.float32, -bound, bound)
    w2 = jax.random.uniform(k3, (3, 3, C, C), jnp.float32, -bound, bound)
    b2 = jax.random.uniform(k4, (C,), jnp.float32, -bound, bound)

    fwd = jax.jit(resblock_forward)
    out = jax.block_until_ready(fwd(x, w1, b1, w2, b2))

    ref = jax.block_until_ready(resblock_reference(x, w1, b1, w2, b2))
    assert out.shape == (N, C, H, W)
    # bf16 MXU operands (both convs) with f32 accumulation vs an f32 reference
    # -> relaxed tolerance.
    max_diff = float(jnp.max(jnp.abs(out - ref)))
    assert jnp.allclose(out, ref, atol=3e-2, rtol=2e-2), (
        f"max abs diff {max_diff}")

    print("KERNEL_OK")
</pallas_src>

<mosaic_0001>
module attributes {stable_mosaic.version = 11 : i64} {
  func.func @kernel(%arg0: i32, %arg1: memref<9x64x1xf32, #tpu.memory_space<vmem>>, %arg2: memref<64x128xf32, #tpu.memory_space<vmem>>, %arg3: memref<3x384x128xbf16, #tpu.memory_space<vmem>>, %arg4: memref<1x128xf32, #tpu.memory_space<vmem>>, %arg5: memref<3x384x128xbf16, #tpu.memory_space<vmem>>, %arg6: memref<1x128xf32, #tpu.memory_space<vmem>>, %arg7: memref<64x128xf32, #tpu.memory_space<vmem>>) attributes {dimension_semantics = [#tpu.dimension_semantics<parallel>], iteration_bounds = array<i64: 2>, scalar_prefetch = 0 : i64, scratch_operands = 0 : i64, tpu.core_type = #tpu.core_type<tc>, window_params = [{pipeline_mode = #tpu.pipeline_mode<synchronous>, transform_indices = @transform_0, window_bounds = array<i64: 9, 64, 1>}, {transform_indices = @transform_1, window_bounds = array<i64: 64, 128>}, {pipeline_mode = #tpu.pipeline_mode<synchronous>, transform_indices = @transform_2, window_bounds = array<i64: 3, 384, 128>}, {pipeline_mode = #tpu.pipeline_mode<synchronous>, transform_indices = @transform_3, window_bounds = array<i64: 1, 128>}, {pipeline_mode = #tpu.pipeline_mode<synchronous>, transform_indices = @transform_4, window_bounds = array<i64: 3, 384, 128>}, {pipeline_mode = #tpu.pipeline_mode<synchronous>, transform_indices = @transform_5, window_bounds = array<i64: 1, 128>}, {transform_indices = @transform_6, window_bounds = array<i64: 64, 128>}]} {
    %c0 = arith.constant 0 : index
    %c0_0 = arith.constant 0 : index
    %c0_1 = arith.constant 0 : index
    %0 = vector.load %arg1[%c0, %c0_0, %c0_1] : memref<9x64x1xf32, #tpu.memory_space<vmem>>, vector<1x64x1xf32>
    %1 = vector.shape_cast %0 : vector<1x64x1xf32> to vector<64x1xf32>
    %c1 = arith.constant 1 : index
    %c0_2 = arith.constant 0 : index
    %c0_3 = arith.constant 0 : index
    %2 = vector.load %arg1[%c1, %c0_2, %c0_3] : memref<9x64x1xf32, #tpu.memory_space<vmem>>, vector<1x64x1xf32>
    %3 = vector.shape_cast %2 : vector<1x64x1xf32> to vector<64x1xf32>
    %c2 = arith.constant 2 : index
    %c0_4 = arith.constant 0 : index
    %c0_5 = arith.constant 0 : index
    %4 = vector.load %arg1[%c2, %c0_4, %c0_5] : memref<9x64x1xf32, #tpu.memory_space<vmem>>, vector<1x64x1xf32>
    %5 = vector.shape_cast %4 : vector<1x64x1xf32> to vector<64x1xf32>
    %c3 = arith.constant 3 : index
    %c0_6 = arith.constant 0 : index
    %c0_7 = arith.constant 0 : index
    %6 = vector.load %arg1[%c3, %c0_6, %c0_7] : memref<9x64x1xf32, #tpu.memory_space<vmem>>, vector<1x64x1xf32>
    %7 = vector.shape_cast %6 : vector<1x64x1xf32> to vector<64x1xf32>
    %c5 = arith.constant 5 : index
    %c0_8 = arith.constant 0 : index
    %c0_9 = arith.constant 0 : index
    %8 = vector.load %arg1[%c5, %c0_8, %c0_9] : memref<9x64x1xf32, #tpu.memory_space<vmem>>, vector<1x64x1xf32>
    %9 = vector.shape_cast %8 : vector<1x64x1xf32> to vector<64x1xf32>
    %c6 = arith.constant 6 : index
    %c0_10 = arith.constant 0 : index
    %c0_11 = arith.constant 0 : index
    %10 = vector.load %arg1[%c6, %c0_10, %c0_11] : memref<9x64x1xf32, #tpu.memory_space<vmem>>, vector<1x64x1xf32>
    %11 = vector.shape_cast %10 : vector<1x64x1xf32> to vector<64x1xf32>
    %c7 = arith.constant 7 : index
    %c0_12 = arith.constant 0 : index
    %c0_13 = arith.constant 0 : index
    %12 = vector.load %arg1[%c7, %c0_12, %c0_13] : memref<9x64x1xf32, #tpu.memory_space<vmem>>, vector<1x64x1xf32>
    %13 = vector.shape_cast %12 : vector<1x64x1xf32> to vector<64x1xf32>
    %c8 = arith.constant 8 : index
    %c0_14 = arith.constant 0 : index
    %c0_15 = arith.constant 0 : index
    %14 = vector.load %arg1[%c8, %c0_14, %c0_15] : memref<9x64x1xf32, #tpu.memory_space<vmem>>, vector<1x64x1xf32>
    %15 = vector.shape_cast %14 : vector<1x64x1xf32> to vector<64x1xf32>
    %c0_16 = arith.constant 0 : index
    %c0_17 = arith.constant 0 : index
    %16 = vector.load %arg2[%c0_16, %c0_17] : memref<64x128xf32, #tpu.memory_space<vmem>>, vector<64x128xf32>
    %c9_i32 = arith.constant 9 : i32
    %17 = tpu.dynamic_rotate %16 by %c9_i32 dim 0 : vector<64x128xf32>, i32 -> vector<64x128xf32>
    %18 = vector.broadcast %1 : vector<64x1xf32> to vector<64x128xf32>
    %19 = arith.mulf %17, %18 : vector<64x128xf32>
    %20 = arith.truncf %19 : vector<64x128xf32> to vector<64x128xbf16>
    %c8_i32 = arith.constant 8 : i32
    %21 = tpu.dynamic_rotate %16 by %c8_i32 dim 0 : vector<64x128xf32>, i32 -> vector<64x128xf32>
    %22 = vector.broadcast %3 : vector<64x1xf32> to vector<64x128xf32>
    %23 = arith.mulf %21, %22 : vector<64x128xf32>
    %24 = arith.truncf %23 : vector<64x128xf32> to vector<64x128xbf16>
    %c7_i32 = arith.constant 7 : i32
    %25 = tpu.dynamic_rotate %16 by %c7_i32 dim 0 : vector<64x128xf32>, i32 -> vector<64x128xf32>
    %26 = vector.broadcast %5 : vector<64x1xf32> to vector<64x128xf32>
    %27 = arith.mulf %25, %26 : vector<64x128xf32>
    %28 = arith.truncf %27 : vector<64x128xf32> to vector<64x128xbf16>
    %29 = tpu.concatenate %20, %24, %28 in 1 : vector<64x128xbf16>, vector<64x128xbf16>, vector<64x128xbf16> -> vector<64x384xbf16>
    %c0_18 = arith.constant 0 : index
    %c0_19 = arith.constant 0 : index
    %c0_20 = arith.constant 0 : index
    %30 = vector.load %arg3[%c0_18, %c0_19, %c0_20] : memref<3x384x128xbf16, #tpu.memory_space<vmem>>, vector<1x384x128xbf16>
    %31 = vector.shape_cast %30 : vector<1x384x128xbf16> to vector<384x128xbf16>
    %cst = arith.constant dense<0.000000e+00> : vector<64x128xf32>
    %32 = tpu.matmul %29, %31, %cst {dimension_numbers = #tpu.dot_dimension_numbers<[1], [0], [0], [1], [0, 0, 1, 1], [], []>} : vector<64x384xbf16>, vector<384x128xbf16>, vector<64x128xf32> -> vector<64x128xf32>
    %c1_i32 = arith.constant 1 : i32
    %33 = tpu.dynamic_rotate %16 by %c1_i32 dim 0 : vector<64x128xf32>, i32 -> vector<64x128xf32>
    %34 = vector.broadcast %7 : vector<64x1xf32> to vector<64x128xf32>
    %35 = arith.mulf %33, %34 : vector<64x128xf32>
    %36 = arith.truncf %35 : vector<64x128xf32> to vector<64x128xbf16>
    %37 = arith.truncf %16 : vector<64x128xf32> to vector<64x128xbf16>
    %c63_i32 = arith.constant 63 : i32
    %38 = tpu.dynamic_rotate %16 by %c63_i32 dim 0 : vector<64x128xf32>, i32 -> vector<64x128xf32>
    %39 = vector.broadcast %9 : vector<64x1xf32> to vector<64x128xf32>
    %40 = arith.mulf %38, %39 : vector<64x128xf32>
    %41 = arith.truncf %40 : vector<64x128xf32> to vector<64x128xbf16>
    %42 = tpu.concatenate %36, %37, %41 in 1 : vector<64x128xbf16>, vector<64x128xbf16>, vector<64x128xbf16> -> vector<64x384xbf16>
    %c1_21 = arith.constant 1 : index
    %c0_22 = arith.constant 0 : index
    %c0_23 = arith.constant 0 : index
    %43 = vector.load %arg3[%c1_21, %c0_22, %c0_23] : memref<3x384x128xbf16, #tpu.memory_space<vmem>>, vector<1x384x128xbf16>
    %44 = vector.shape_cast %43 : vector<1x384x128xbf16> to vector<384x128xbf16>
    %cst_24 = arith.constant dense<0.000000e+00> : vector<64x128xf32>
    %45 = tpu.matmul %42, %44, %cst_24 {dimension_numbers = #tpu.dot_dimension_numbers<[1], [0], [0], [1], [0, 0, 1, 1], [], []>} : vector<64x384xbf16>, vector<384x128xbf16>, vector<64x128xf32> -> vector<64x128xf32>
    %46 = arith.addf %32, %45 : vector<64x128xf32>
    %c57_i32 = arith.constant 57 : i32
    %47 = tpu.dynamic_rotate %16 by %c57_i32 dim 0 : vector<64x128xf32>, i32 -> vector<64x128xf32>
    %48 = vector.broadcast %11 : vector<64x1xf32> to vector<64x128xf32>
    %49 = arith.mulf %47, %48 : vector<64x128xf32>
    %50 = arith.truncf %49 : vector<64x128xf32> to vector<64x128xbf16>
    %c56_i32 = arith.constant 56 : i32
    %51 = tpu.dynamic_rotate %16 by %c56_i32 dim 0 : vector<64x128xf32>, i32 -> vector<64x128xf32>
    %52 = vector.broadcast %13 : vector<64x1xf32> to vector<64x128xf32>
    %53 = arith.mulf %51, %52 : vector<64x128xf32>
    %54 = arith.truncf %53 : vector<64x128xf32> to vector<64x128xbf16>
    %c55_i32 = arith.constant 55 : i32
    %55 = tpu.dynamic_rotate %16 by %c55_i32 dim 0 : vector<64x128xf32>, i32 -> vector<64x128xf32>
    %56 = vector.broadcast %15 : vector<64x1xf32> to vector<64x128xf32>
    %57 = arith.mulf %55, %56 : vector<64x128xf32>
    %58 = arith.truncf %57 : vector<64x128xf32> to vector<64x128xbf16>
    %59 = tpu.concatenate %50, %54, %58 in 1 : vector<64x128xbf16>, vector<64x128xbf16>, vector<64x128xbf16> -> vector<64x384xbf16>
    %c2_25 = arith.constant 2 : index
    %c0_26 = arith.constant 0 : index
    %c0_27 = arith.constant 0 : index
    %60 = vector.load %arg3[%c2_25, %c0_26, %c0_27] : memref<3x384x128xbf16, #tpu.memory_space<vmem>>, vector<1x384x128xbf16>
    %61 = vector.shape_cast %60 : vector<1x384x128xbf16> to vector<384x128xbf16>
    %cst_28 = arith.constant dense<0.000000e+00> : vector<64x128xf32>
    %62 = tpu.matmul %59, %61, %cst_28 {dimension_numbers = #tpu.dot_dimension_numbers<[1], [0], [0], [1], [0, 0, 1, 1], [], []>} : vector<64x384xbf16>, vector<384x128xbf16>, vector<64x128xf32> -> vector<64x128xf32>
    %63 = arith.addf %46, %62 : vector<64x128xf32>
    %c0_29 = arith.constant 0 : index
    %c0_30 = arith.constant 0 : index
    %64 = vector.load %arg4[%c0_29, %c0_30] : memref<1x128xf32, #tpu.memory_space<vmem>>, vector<1x128xf32>
    %65 = vector.broadcast %64 : vector<1x128xf32> to vector<64x128xf32>
    %66 = arith.addf %63, %65 : vector<64x128xf32>
    %cst_31 = arith.constant 0.000000e+00 : f32
    %67 = vector.broadcast %cst_31 : f32 to vector<64x128xf32>
    %68 = arith.cmpf ogt, %66, %67 : vector<64x128xf32>
    %cst_32 = arith.constant 0.00999999977 : f32
    %69 = vector.broadcast %cst_32 : f32 to vector<64x128xf32>
    %70 = arith.mulf %69, %66 : vector<64x128xf32>
    %71 = arith.select %68, %66, %70 : vector<64x128xi1>, vector<64x128xf32>
    %c9_i32_33 = arith.constant 9 : i32
    %72 = tpu.dynamic_rotate %71 by %c9_i32_33 dim 0 : vector<64x128xf32>, i32 -> vector<64x128xf32>
    %73 = vector.broadcast %1 : vector<64x1xf32> to vector<64x128xf32>
    %74 = arith.mulf %72, %73 : vector<64x128xf32>
    %75 = arith.truncf %74 : vector<64x128xf32> to vector<64x128xbf16>
    %c8_i32_34 = arith.constant 8 : i32
    %76 = tpu.dynamic_rotate %71 by %c8_i32_34 dim 0 : vector<64x128xf32>, i32 -> vector<64x128xf32>
    %77 = vector.broadcast %3 : vector<64x1xf32> to vector<64x128xf32>
    %78 = arith.mulf %76, %77 : vector<64x128xf32>
    %79 = arith.truncf %78 : vector<64x128xf32> to vector<64x128xbf16>
    %c7_i32_35 = arith.constant 7 : i32
    %80 = tpu.dynamic_rotate %71 by %c7_i32_35 dim 0 : vector<64x128xf32>, i32 -> vector<64x128xf32>
    %81 = vector.broadcast %5 : vector<64x1xf32> to vector<64x128xf32>
    %82 = arith.mulf %80, %81 : vector<64x128xf32>
    %83 = arith.truncf %82 : vector<64x128xf32> to vector<64x128xbf16>
    %84 = tpu.concatenate %75, %79, %83 in 1 : vector<64x128xbf16>, vector<64x128xbf16>, vector<64x128xbf16> -> vector<64x384xbf16>
    %c0_36 = arith.constant 0 : index
    %c0_37 = arith.constant 0 : index
    %c0_38 = arith.constant 0 : index
    %85 = vector.load %arg5[%c0_36, %c0_37, %c0_38] : memref<3x384x128xbf16, #tpu.memory_space<vmem>>, vector<1x384x128xbf16>
    %86 = vector.shape_cast %85 : vector<1x384x128xbf16> to vector<384x128xbf16>
    %cst_39 = arith.constant dense<0.000000e+00> : vector<64x128xf32>
    %87 = tpu.matmul %84, %86, %cst_39 {dimension_numbers = #tpu.dot_dimension_numbers<[1], [0], [0], [1], [0, 0, 1, 1], [], []>} : vector<64x384xbf16>, vector<384x128xbf16>, vector<64x128xf32> -> vector<64x128xf32>
    %c1_i32_40 = arith.constant 1 : i32
    %88 = tpu.dynamic_rotate %71 by %c1_i32_40 dim 0 : vector<64x128xf32>, i32 -> vector<64x128xf32>
    %89 = vector.broadcast %7 : vector<64x1xf32> to vector<64x128xf32>
    %90 = arith.mulf %88, %89 : vector<64x128xf32>
    %91 = arith.truncf %90 : vector<64x128xf32> to vector<64x128xbf16>
    %92 = arith.truncf %71 : vector<64x128xf32> to vector<64x128xbf16>
    %c63_i32_41 = arith.constant 63 : i32
    %93 = tpu.dynamic_rotate %71 by %c63_i32_41 dim 0 : vector<64x128xf32>, i32 -> vector<64x128xf32>
    %94 = vector.broadcast %9 : vector<64x1xf32> to vector<64x128xf32>
    %95 = arith.mulf %93, %94 : vector<64x128xf32>
    %96 = arith.truncf %95 : vector<64x128xf32> to vector<64x128xbf16>
    %97 = tpu.concatenate %91, %92, %96 in 1 : vector<64x128xbf16>, vector<64x128xbf16>, vector<64x128xbf16> -> vector<64x384xbf16>
    %c1_42 = arith.constant 1 : index
    %c0_43 = arith.constant 0 : index
    %c0_44 = arith.constant 0 : index
    %98 = vector.load %arg5[%c1_42, %c0_43, %c0_44] : memref<3x384x128xbf16, #tpu.memory_space<vmem>>, vector<1x384x128xbf16>
    %99 = vector.shape_cast %98 : vector<1x384x128xbf16> to vector<384x128xbf16>
    %cst_45 = arith.constant dense<0.000000e+00> : vector<64x128xf32>
    %100 = tpu.matmul %97, %99, %cst_45 {dimension_numbers = #tpu.dot_dimension_numbers<[1], [0], [0], [1], [0, 0, 1, 1], [], []>} : vector<64x384xbf16>, vector<384x128xbf16>, vector<64x128xf32> -> vector<64x128xf32>
    %101 = arith.addf %87, %100 : vector<64x128xf32>
    %c57_i32_46 = arith.constant 57 : i32
    %102 = tpu.dynamic_rotate %71 by %c57_i32_46 dim 0 : vector<64x128xf32>, i32 -> vector<64x128xf32>
    %103 = vector.broadcast %11 : vector<64x1xf32> to vector<64x128xf32>
    %104 = arith.mulf %102, %103 : vector<64x128xf32>
    %105 = arith.truncf %104 : vector<64x128xf32> to vector<64x128xbf16>
    %c56_i32_47 = arith.constant 56 : i32
    %106 = tpu.dynamic_rotate %71 by %c56_i32_47 dim 0 : vector<64x128xf32>, i32 -> vector<64x128xf32>
    %107 = vector.broadcast %13 : vector<64x1xf32> to vector<64x128xf32>
    %108 = arith.mulf %106, %107 : vector<64x128xf32>
    %109 = arith.truncf %108 : vector<64x128xf32> to vector<64x128xbf16>
    %c55_i32_48 = arith.constant 55 : i32
    %110 = tpu.dynamic_rotate %71 by %c55_i32_48 dim 0 : vector<64x128xf32>, i32 -> vector<64x128xf32>
    %111 = vector.broadcast %15 : vector<64x1xf32> to vector<64x128xf32>
    %112 = arith.mulf %110, %111 : vector<64x128xf32>
    %113 = arith.truncf %112 : vector<64x128xf32> to vector<64x128xbf16>
    %114 = tpu.concatenate %105, %109, %113 in 1 : vector<64x128xbf16>, vector<64x128xbf16>, vector<64x128xbf16> -> vector<64x384xbf16>
    %c2_49 = arith.constant 2 : index
    %c0_50 = arith.constant 0 : index
    %c0_51 = arith.constant 0 : index
    %115 = vector.load %arg5[%c2_49, %c0_50, %c0_51] : memref<3x384x128xbf16, #tpu.memory_space<vmem>>, vector<1x384x128xbf16>
    %116 = vector.shape_cast %115 : vector<1x384x128xbf16> to vector<384x128xbf16>
    %cst_52 = arith.constant dense<0.000000e+00> : vector<64x128xf32>
    %117 = tpu.matmul %114, %116, %cst_52 {dimension_numbers = #tpu.dot_dimension_numbers<[1], [0], [0], [1], [0, 0, 1, 1], [], []>} : vector<64x384xbf16>, vector<384x128xbf16>, vector<64x128xf32> -> vector<64x128xf32>
    %118 = arith.addf %101, %117 : vector<64x128xf32>
    %c0_53 = arith.constant 0 : index
    %c0_54 = arith.constant 0 : index
    %119 = vector.load %arg6[%c0_53, %c0_54] : memref<1x128xf32, #tpu.memory_space<vmem>>, vector<1x128xf32>
    %120 = vector.broadcast %119 : vector<1x128xf32> to vector<64x128xf32>
    %121 = arith.addf %118, %120 : vector<64x128xf32>
    %122 = arith.addf %121, %16 : vector<64x128xf32>
    %cst_55 = arith.constant 0.000000e+00 : f32
    %123 = vector.broadcast %cst_55 : f32 to vector<64x128xf32>
    %124 = arith.cmpf ogt, %122, %123 : vector<64x128xf32>
    %cst_56 = arith.constant 0.00999999977 : f32
    %125 = vector.broadcast %cst_56 : f32 to vector<64x128xf32>
    %126 = arith.mulf %125, %122 : vector<64x128xf32>
    %127 = arith.select %124, %122, %126 : vector<64x128xi1>, vector<64x128xf32>
    %c0_57 = arith.constant 0 : index
    %c0_58 = arith.constant 0 : index
    %128 = vector.load %arg7[%c0_57, %c0_58] : memref<64x128xf32, #tpu.memory_space<vmem>>, vector<64x128xf32>
    tpu.vector_store %arg7[%c0_57, %c0_58], %127 {strides = array<i32>} : memref<64x128xf32, #tpu.memory_space<vmem>>, vector<64x128xf32>,
    return
  }
  func.func @transform_0(%arg0: i32) -> (i32, i32, i32) {
    %c0_i32 = arith.constant 0 : i32
    %c0_i32_0 = arith.constant 0 : i32
    %c0_i32_1 = arith.constant 0 : i32
    %c0_i32_2 = arith.constant 0 : i32
    return %c0_i32, %c0_i32_0, %c0_i32_1 : i32, i32, i32
  }
  func.func @transform_1(%arg0: i32) -> (i32, i32) {
    %c0_i32 = arith.constant 0 : i32
    %c0_i32_0 = arith.constant 0 : i32
    return %arg0, %c0_i32 : i32, i32
  }
  func.func @transform_2(%arg0: i32) -> (i32, i32, i32) {
    %c0_i32 = arith.constant 0 : i32
    %c0_i32_0 = arith.constant 0 : i32
    %c0_i32_1 = arith.constant 0 : i32
    %c0_i32_2 = arith.constant 0 : i32
    return %c0_i32, %c0_i32_0, %c0_i32_1 : i32, i32, i32
  }
  func.func @transform_3(%arg0: i32) -> (i32, i32) {
    %c0_i32 = arith.constant 0 : i32
    %c0_i32_0 = arith.constant 0 : i32
    %c0_i32_1 = arith.constant 0 : i32
    return %c0_i32, %c0_i32_0 : i32, i32
  }
  func.func @transform_4(%arg0: i32) -> (i32, i32, i32) {
    %c0_i32 = arith.constant 0 : i32
    %c0_i32_0 = arith.constant 0 : i32
    %c0_i32_1 = arith.constant 0 : i32
    %c0_i32_2 = arith.constant 0 : i32
    return %c0_i32, %c0_i32_0, %c0_i32_1 : i32, i32, i32
  }
  func.func @transform_5(%arg0: i32) -> (i32, i32) {
    %c0_i32 = arith.constant 0 : i32
    %c0_i32_0 = arith.constant 0 : i32
    %c0_i32_1 = arith.constant 0 : i32
    return %c0_i32, %c0_i32_0 : i32, i32
  }
  func.func @transform_6(%arg0: i32) -> (i32, i32) {
    %c0_i32 = arith.constant 0 : i32
    %c0_i32_0 = arith.constant 0 : i32
    return %arg0, %c0_i32 : i32, i32
  }
}

</mosaic_0001>

<bundles_post_ra>
// kernel: resblock_forward.1
= control target key start
LH: loop header
LB: loop body
LE: loop exit
PB: predicated region body
PF: predicated region fallthrough
CT: control target
= control target key end

     0   :  { %11 = vsyncpa [#allocation3], 0  ;;  %s6002_s0 = inlined_call_operand.vmem [shape: f32[9,64,1], index: 0, kind: input, shape index: {}]   ;;  %s6003_s1 = inlined_call_operand.vmem [shape: f32[128,128], index: 1, kind: input, shape index: {}]   ;;  %s6004_s2 = inlined_call_operand.vmem [shape: bf16[3,384,128], index: 2, kind: input, shape index: {}]   ;;  %s6005_s3 = inlined_call_operand.vmem [shape: f32[1,128], index: 3, kind: input, shape index: {}]   ;;  %s6006_s4 = inlined_call_operand.vmem [shape: bf16[3,384,128], index: 4, kind: input, shape index: {}]   ;;  %s6007_s5 = inlined_call_operand.vmem [shape: f32[1,128], index: 5, kind: input, shape index: {}]   ;;  %s6008_s6 = inlined_call_operand.hbm [shape: f32[128,128], index: 6, kind: output, shape index: {}]  }
   0x1   :  { %13 = vsyncpa [#allocation3 + $0x1], 0  ;;  %s4288_s21 = smov 0   ;;  %s4290_s22 = smov 0  }
   0x2   :  { %s4292_s23 = smov 0   ;;  %s4294_s24 = smov 0  }
   0x3 LB: > { %s4309_s25 = sadd.s32 4294967295, %s4247_s24   ;;  %s3043_s26 = sadd.s32 4294967294, %s4247_s24   ;;  %s4247_s24 = sphi %s4294_s24, %s6139_s24   ;;  %s4243_s23 = sphi %s4292_s23, %s6138_s23   ;;  %s4239_s22 = sphi %s4290_s22, %s6137_s22   ;;  %s4235_s21 = sphi %s4288_s21, %s6136_s21  }
   0x4   : > { %s4313_s27 = sadd.s32 1, %s4247_s24   ;;  %s157_s28 = sadd.s32 1, %s4243_s23 }
   0x5   : > { %s154_s29 = ssub.s32 %s4247_s24, %s4313_s27  ;;  %p167_p0 = scmp.ne.s32.totalorder %s4243_s23, %s4239_s22 }
   0x6   : > { %p155_p1 = scmp.eq.s32.totalorder %s154_s29, 0  ;;  %p168_p2 = scmp.eq.s32.totalorder %s4309_s25, 1 }
   0x7   : > { %p173_p3 = scmp.ne.s32.totalorder %s4239_s22, %s4235_s21  ;;  %p174_p4 = scmp.eq.s32.totalorder %s3043_s26, 1 }
   0x8   : > { %s4324_s30 = scalar_select %p155_p1, %s4243_s23, %s157_s28  }
   0x9   : > { %p4326_p5 = por %p168_p2, %p167_p0  ;;  %p4330_p6 = por %p174_p4, %p173_p3 }
   0xa   : > { %p3046_p7 = scmp.ge.s32.totalorder %s4247_s24, 1  ;;  %p216_p8 = scmp.lt.s32.totalorder %s4247_s24, 3 }
   0xc   : > { %p217_p9 = pnand %p3046_p7, %p216_p8 }
   0xe   : > { %220 = sbr.rel (%p217_p9) target bundleno = 840 (0x348), region = 44 }
  0x15   : > { %v3068_v0 = vld [vmem:[%s6002_s0 + $0xd0] sm:$0xff]  ;;  %v3066_v1 = vld [vmem:[%s6002_s0 + $0xc0] sm:$0xff]  ;;  %v4249_v2 = vmov 0   ;;  %v3069_v3 = vld [vmem:[%s6002_s0 + $0xd8] sm:$0xff]  ;;  %s3048_s9 = sshll.u32 %s4309_s25, 3  ;;  %s243_s12 = sand.u32 1, %s4239_s22  }
  0x16   : > { %4029 = vset.pattern.permute.xlu1 %v4249_v2  ;;  %4028 = vset.pattern.permute.xlu0 %v4249_v2  ;;  %v3067_v4 = vld [vmem:[%s6002_s0 + $0xc8] sm:$0xff]  ;;  %v3070_v6 = vld [vmem:[%s6002_s0 + $0xe0] sm:$0xff]  ;;  %v3077_v9 = vld [vmem:[%s6002_s0 + $0x158] sm:$0xff]  ;;  %p247_p10 = scmp.lt.s32.totalorder %s3048_s9, 15  ;;  %s3047_s13 = sshll.u32 %s243_s12, 6 }
  0x17   : > { %585 = vperm.xlu1 %4029, %v3068_v0   ;;  %575 = vperm.xlu0 %4028, %v3066_v1   ;;  %v3071_v5 = vld [vmem:[%s6002_s0 + $0xe8] sm:$0xff]  ;;  %v3074_v8 = vld [vmem:[%s6002_s0 + $0x140] sm:$0xff]  ;;  %v3076_v10 = vld [vmem:[%s6002_s0 + $0x150] sm:$0xff]  ;;  %s5922_s14 = scalar_lea.vmem [#allocation2], %s3047_s13 }
  0x18   : > { %v3075_v7 = vld [vmem:[%s6002_s0 + $0x148] sm:$0xff]  ;;  %v3073_v11 = vld [vmem:[%s6002_s0 + $0xf8] sm:$0xff]  ;;  %v3072_v12 = vld [vmem:[%s6002_s0 + $0xf0] sm:$0xff]  ;;  %s6141_s9 = smov (!%p247_p10, %s3048_s9), 15  ;;  %s2981_s15 = sshll.u32 %s5922_s14, 4  ;;  %s5956_s15 = int_to_ptr.vmem [resolvable:$true] %s2981_s15 }
  0x19   : > { %v4030_v13 = vld [vmem:[%s6004_s2 + $0x100] sm:$0xff]   ;;  %v4032_v15 = vld [vmem:[%s6004_s2 + $0x108] sm:$0xff]   ;;  %v4034_v19 = vld [vmem:[%s6004_s2 + $0x110] sm:$0xff]   ;;  %s3049_s10 = sshll.u32 %s6141_s9, 3  ;;  %s4250_s9 = smov [#allocation2]  }
  0x1a   : > { %v4031_v14 = vld [vmem:[%s6004_s2 + $0xc0] sm:$0xff]   ;;  %3450 = vmatprep.subr.bf16.mxu0 %v4030_v13  ;;  %v3051_v16 = vld [vmem:[%s6002_s0 + $0x48] sm:$0xff]  ;;  %v4035_v20 = vld [vmem:[%s6004_s2 + $0xd0] sm:$0xff]   ;;  %s4439_s20 = scalar_lea.vmem %s6003_s1, %s3049_s10  ;;  %s3449_s10 = sshll.u32 %s4309_s25, 10 }
  0x1b   : > { %590 = vperm.xlu1 %4029, %v3069_v3   ;;  %580 = vperm.xlu0 %4028, %v3067_v4   ;;  %v4033_v17 = vld [vmem:[%s6004_s2 + $0xc8] sm:$0xff]   ;;  %v3050_v18 = vld [vmem:[%s6002_s0 + $0x40] sm:$0xff]  ;;  %v4036_v23 = vld [vmem:[%s6004_s2 + $0x118] sm:$0xff]   ;;  %s5954_s18 = scalar_lea.hbm %s6008_s6, %s3449_s10  ;;  %s5961_s25 = scalar_lea.sflag [#allocation3], %s243_s12 }
  0x1c   : > { %3451 = vmatpush3.bf16.msra.mxu0 %v4031_v14  ;;  %v255_v21 = vld [vmem:[%s6002_s0 + $0x8] sm:$0xff]  ;;  %v254_v22 = vld [vmem:[%s6002_s0] sm:$0xff]  ;;  %v3053_v25 = vld [vmem:[%s6002_s0 + $0x58] sm:$0xff]  ;;  %s4189_s19 = sshll.u32 %s4250_s9, 4  ;;  %s4190_s19 = int_to_ptr.vmem [resolvable:$false] %s4189_s19 }
  0x1d   : > { %3452 = vmatprep.subr.bf16.mxu0 %v4032_v15  ;;  %v4037_v24 = vld [vmem:[%s6004_s2 + $0x140] sm:$0xff]   ;;  %v4038_v26 = vld [vmem:[%s6004_s2 + $0xd8] sm:$0xff]   ;;  %v4040_v27 = vld [vmem:[%s6004_s2 + $0x148] sm:$0xff]   ;;  %s4191_s26 = scalar_lea.vmem %s4190_s19, 2048  ;;  %p4192_p0 = scmp.lt.s32.totalorder %s5956_s15, %s4190_s19 }
  0x1e   : > { %3762 = vmatprep.subr.bf16.mxu1 %v4037_v24  ;;  %v3052_v28 = vld [vmem:[%s6002_s0 + $0x50] sm:$0xff]  ;;  %v4039_v29 = vld [vmem:[%s6004_s2 + $0x120] sm:$0xff]   ;;  %v257_v30 = vld [vmem:[%s6002_s0 + $0x18] sm:$0xff] }
  0x1f   : > { %600 = vperm.xlu1 %4029, %v3071_v5   ;;  %595 = vperm.xlu0 %4028, %v3070_v6   ;;  %v4041_v31 = vld [vmem:[%s6004_s2 + $0xe0] sm:$0xff]   ;;  %v256_v32 = vld [vmem:[%s6002_s0 + $0x10] sm:$0xff]  ;;  %v4042_v34 = vld [vmem:[%s6004_s2 + $0x128] sm:$0xff]  }
  0x20   : > { %3453 = vmatpush3.bf16.msra.mxu0 %v4033_v17  ;;  %3763 = vmatpush3.bf16.msra.mxu1 %v4037_v24  ;;  %v4043_v33 = vld [vmem:[%s6004_s2 + $0x150] sm:$0xff]   ;;  %v4044_v35 = vld [vmem:[%s6004_s2 + $0xe8] sm:$0xff]   ;;  %v3078_v37 = vld [vmem:[%s6002_s0 + $0x160] sm:$0xff] }
  0x21   : > { %3454 = vmatprep.subr.bf16.mxu0 %v4034_v19  ;;  %3764 = vmatprep.subr.bf16.mxu1 %v4040_v27  ;;  %v3079_v36 = vld [vmem:[%s6002_s0 + $0x168] sm:$0xff]  ;;  %v4457_v39 = vld [vmem:[%s4439_s20] sm:$0xff]  ;;  %v4045_v40 = vld [vmem:[%s6004_s2 + $0x130] sm:$0xff]  }
  0x22   : > { %v4454_v38 = vld [vmem:[%s4439_s20 + $0x8] sm:$0xff]  ;;  %v4046_v41 = vld [vmem:[%s6004_s2 + $0x158] sm:$0xff]   ;;  %v3080_v44 = vld [vmem:[%s6002_s0 + $0x170] sm:$0xff] }
  0x23   : > { %636 = vperm.xlu1 %4029, %v3075_v7   ;;  %631 = vperm.xlu0 %4028, %v3074_v8   ;;  %v625_v42 = vpack.c.bf16 %v4454_v38, %v4457_v39  ;;  %v3081_v43 = vld [vmem:[%s6002_s0 + $0x178] sm:$0xff]  ;;  %v4047_v45 = vld [vmem:[%s6004_s2 + $0xf0] sm:$0xff]   ;;  %v4049_v46 = vld [vmem:[%s6004_s2 + $0x160] sm:$0xff]  }
  0x24   : > { %3455 = vmatpush3.bf16.msra.mxu0 %v4035_v20  ;;  %3765 = vmatpush3.bf16.msra.mxu1 %v4040_v27  ;;  %v4048_v47 = vld [vmem:[%s6004_s2 + $0x138] sm:$0xff]   ;;  %v3055_v48 = vld [vmem:[%s6002_s0 + $0x68] sm:$0xff]  ;;  %v3054_v49 = vld [vmem:[%s6002_s0 + $0x60] sm:$0xff]  ;;  %v333_v20 = vrot.slane %v4457_v39, 7 }
  0x25   : > { %3456 = vmatprep.subr.bf16.mxu0 %v4036_v23  ;;  %3766 = vmatprep.subr.bf16.mxu1 %v4043_v33  ;;  %v4050_v50 = vld [vmem:[%s6004_s2 + $0xf8] sm:$0xff]   ;;  %v4051_v51 = vld [vmem:[%s6004_s2 + $0x168] sm:$0xff]   ;;  %v4052_v52 = vld [vmem:[%s6004_s2 + $0x40] sm:$0xff]   ;;  %v457_v23 = vrot.slane %v4454_v38, 1 }
  0x26   : > { %906 = vmatprep.mubr.bf16.mxu0 %v625_v42  ;;  %v4054_v53 = vld [vmem:[%s6004_s2 + $0x170] sm:$0xff]   ;;  %v259_v54 = vld [vmem:[%s6002_s0 + $0x28] sm:$0xff]  ;;  %v258_v55 = vld [vmem:[%s6002_s0 + $0x20] sm:$0xff] }
  0x27   : > { %646 = vperm.xlu1 %4029, %v3077_v9   ;;  %641 = vperm.xlu0 %4028, %v3076_v10   ;;  %v4057_v56 = vld [vmem:[%s6004_s2 + $0x178] sm:$0xff]   ;;  %v3059_v57 = vld [vmem:[%s6002_s0 + $0x88] sm:$0xff]  ;;  %v3058_v58 = vld [vmem:[%s6002_s0 + $0x80] sm:$0xff]  ;;  %v341_v10 = vlaneseq }
  0x28   : > { %3457 = vmatpush3.bf16.msra.mxu0 %v4038_v26  ;;  %3767 = vmatpush3.bf16.msra.mxu1 %v4043_v33  ;;  %v3061_v59 = vld [vmem:[%s6002_s0 + $0x98] sm:$0xff]  ;;  %v3060_v60 = vld [vmem:[%s6002_s0 + $0x90] sm:$0xff]  ;;  %v4524_v61 = vld [vmem:[%s6004_s2 + $0x80] sm:$0xff]  }
  0x29   : > { %3458 = vmatprep.subr.bf16.mxu0 %v4039_v29  ;;  %3768 = vmatprep.subr.bf16.mxu1 %v4046_v41  ;;  %v3057_v62 = vld [vmem:[%s6002_s0 + $0x78] sm:$0xff]  ;;  %v3056_v63 = vld [vmem:[%s6002_s0 + $0x70] sm:$0xff]  ;;  %v3091_v2 = vld [vmem:[%s6002_s0 + $0x1c8] sm:$0xff]  ;;  %v4575_v15 = vshrl.u32 %v341_v10, 7 }
  0x2a   : > { %v261_v0 = vld [vmem:[%s6002_s0 + $0x38] sm:$0xff]  ;;  %v260_v1 = vld [vmem:[%s6002_s0 + $0x30] sm:$0xff]  ;;  %v3090_v3 = vld [vmem:[%s6002_s0 + $0x1c0] sm:$0xff] }
  0x2b   : > { %610 = vperm.xlu1 %4029, %v3073_v11   ;;  %605 = vperm.xlu0 %4028, %v3072_v12   ;;  %v3083_v4 = vld [vmem:[%s6002_s0 + $0x188] sm:$0xff]  ;;  %v3082_v5 = vld [vmem:[%s6002_s0 + $0x180] sm:$0xff]  ;;  %v3093_v6 = vld [vmem:[%s6002_s0 + $0x1d8] sm:$0xff]  ;;  %vm343_vm0 = vcmp.lt.s32.totalorder %v4575_v15, 1  ;;  %vm464_vm1 = vcmp.lt.s32.totalorder %v4575_v15, 7 }
  0x2c   : > { %3459 = vmatpush3.bf16.msra.mxu0 %v4041_v31  ;;  %3769 = vmatpush3.bf16.msra.mxu1 %v4046_v41  ;;  %v3092_v7 = vld [vmem:[%s6002_s0 + $0x1d0] sm:$0xff]  ;;  %v3085_v8 = vld [vmem:[%s6002_s0 + $0x198] sm:$0xff]  ;;  %v3063_v11 = vld [vmem:[%s6002_s0 + $0xa8] sm:$0xff] }
  0x2d   : > { %3460 = vmatprep.subr.bf16.mxu0 %v4042_v34  ;;  %3770 = vmatprep.subr.bf16.mxu1 %v4049_v46  ;;  %v3084_v9 = vld [vmem:[%s6002_s0 + $0x190] sm:$0xff]  ;;  %v3062_v12 = vld [vmem:[%s6002_s0 + $0xa0] sm:$0xff]  ;;  %v4573_v14 = vld [vmem:[%s4439_s20 + $0x38] sm:$0xff] }
  0x2e   : > { %v4570_v13 = vld [vmem:[%s4439_s20 + $0x10] sm:$0xff]  ;;  %v3094_v26 = vld [vmem:[%s6002_s0 + $0x1e0] sm:$0xff]  ;;  %v3087_v29 = vld [vmem:[%s6002_s0 + $0x1a8] sm:$0xff] }
  0x2f   : > { %411 = vperm.xlu1 %4029, %v3051_v16   ;;  %406 = vperm.xlu0 %4028, %v3050_v18   ;;  %v3065_v16 = vld [vmem:[%s6002_s0 + $0xb8] sm:$0xff]  ;;  %v3064_v17 = vld [vmem:[%s6002_s0 + $0xb0] sm:$0xff]  ;;  %v334_v18 = vrot.slane %v4454_v38, 7  ;;  %v335_v19 = vrot.slane %v4570_v13, 7  ;;  %v458_v24 = vrot.slane %v4570_v13, 1  ;;  %v4607_v31 = vld [vmem:[%s4439_s20 + $0x20] sm:$0xff] }
  0x30   : > { %3461 = vmatpush3.bf16.msra.mxu0 %v4044_v35  ;;  %3771 = vmatpush3.bf16.msra.mxu1 %v4049_v46  ;;  %v3099_v33 = vld [vmem:[%s6002_s0 + $0x208] sm:$0xff]  ;;  %v3098_v34 = vld [vmem:[%s6002_s0 + $0x200] sm:$0xff]  ;;  %v460_v42 = vrot.slane %v4607_v31, 1  ;;  %v3088_v46 = vld [vmem:[%s6002_s0 + $0x1b0] sm:$0xff] }
  0x31   : > { %3462 = vmatprep.subr.bf16.mxu0 %v4045_v40  ;;  %3772 = vmatprep.subr.bf16.mxu1 %v4051_v51  ;;  %v4617_v35 = vld [vmem:[%s4439_s20 + $0x28] sm:$0xff]  ;;  %v3100_v40 = vld [vmem:[%s6002_s0 + $0x210] sm:$0xff] }
  0x32   : > { %v338_v41 = vrot.slane %v4617_v35, 7 }
  0x33   : > { %359 = vperm.xlu1 %4029, %v255_v21   ;;  %354 = vperm.xlu0 %4028, %v254_v22   ;;  %v340_v21 = vrot.slane %v4573_v14, 7  ;;  %v4588_v22 = vld [vmem:[%s4439_s20 + $0x18] sm:$0xff] }
  0x34   : > { %3463 = vmatpush3.bf16.msra.mxu0 %v4047_v45  ;;  %3773 = vmatpush3.bf16.msra.mxu1 %v4051_v51  ;;  %v336_v27 = vrot.slane %v4588_v22, 7  ;;  %v3089_v45 = vld [vmem:[%s6002_s0 + $0x1b8] sm:$0xff] }
  0x35   : > { %3464 = vmatprep.subr.bf16.mxu0 %v4048_v47  ;;  %3774 = vmatprep.subr.bf16.mxu1 %v4054_v53  ;;  %v3103_v47 = vld [vmem:[%s6002_s0 + $0x228] sm:$0xff] }
  0x37   : > { %421 = vperm.xlu1 %4029, %v3053_v25   ;;  %416 = vperm.xlu0 %4028, %v3052_v28   ;;  %v3095_v25 = vld [vmem:[%s6002_s0 + $0x1e8] sm:$0xff]  ;;  %v456_v28 = vrot.slane %v4457_v39, 1 }
  0x38   : > { %3465 = vmatpush3.bf16.msra.mxu0 %v4050_v50  ;;  %3775 = vmatpush3.bf16.msra.mxu1 %v4054_v53  ;;  %v3104_v50 = vld [vmem:[%s6002_s0 + $0x230] sm:$0xff]  ;;  %v4662_v53 = vsel %vm343_vm0, %v340_v21, %v333_v20 }
  0x39   : > { %3502 = vmatprep.subr.bf16.mxu0 %v4052_v52  ;;  %3776 = vmatprep.subr.bf16.mxu1 %v4057_v56 }
  0x3b   : > { %369 = vperm.xlu1 %4029, %v257_v30   ;;  %364 = vperm.xlu0 %4028, %v256_v32   ;;  %v3086_v30 = vld [vmem:[%s6002_s0 + $0x1a0] sm:$0xff]  ;;  %v459_v32 = vrot.slane %v4588_v22, 1 }
  0x3c   : > { %3777 = vmatpush3.bf16.msra.mxu1 %v4057_v56 }
  0x3d   : > { %3786 = vmatprep.subr.bf16.mxu1 %v4524_v61 }
  0x3f   : > { %656 = vperm.xlu1 %4029, %v3079_v36   ;;  %651 = vperm.xlu0 %4028, %v3078_v37   ;;  %v337_v36 = vrot.slane %v4607_v31, 7  ;;  %v3101_v37 = vld [vmem:[%s6002_s0 + $0x218] sm:$0xff] }
  0x43   : > { %666 = vperm.xlu1 %4029, %v3081_v43   ;;  %661 = vperm.xlu0 %4028, %v3080_v44   ;;  %v3097_v43 = vld [vmem:[%s6002_s0 + $0x1f8] sm:$0xff]  ;;  %v3096_v44 = vld [vmem:[%s6002_s0 + $0x1f0] sm:$0xff] }
  0x47   : > { %431 = vperm.xlu1 %4029, %v3055_v48   ;;  %426 = vperm.xlu0 %4028, %v3054_v49   ;;  %v3102_v48 = vld [vmem:[%s6002_s0 + $0x220] sm:$0xff]  ;;  %v3105_v49 = vld [vmem:[%s6002_s0 + $0x238] sm:$0xff] }
  0x4b   : > { %379 = vperm.xlu1 %4029, %v259_v54   ;;  %374 = vperm.xlu0 %4028, %v258_v55   ;;  %v4668_v54 = vsel %vm343_vm0, %v333_v20, %v334_v18 }
  0x4f   : > { %480 = vperm.xlu1 %4029, %v3059_v57   ;;  %475 = vperm.xlu0 %4028, %v3058_v58   ;;  %v4053_v57 = vld [vmem:[%s6004_s2] sm:$0xff]  }
  0x53   : > { %490 = vperm.xlu1 %4029, %v3061_v59   ;;  %485 = vperm.xlu0 %4028, %v3060_v60   ;;  %v4055_v60 = vld [vmem:[%s6004_s2 + $0x48] sm:$0xff]  }
  0x57   : > { %441 = vperm.xlu1 %4029, %v3057_v62   ;;  %436 = vperm.xlu0 %4028, %v3056_v63   ;;  %v626_v62 = vpack.c.bf16 %v4588_v22, %v4570_v13 }
  0x5b   : > { %389 = vperm.xlu1 %4029, %v261_v0   ;;  %384 = vperm.xlu0 %4028, %v260_v1   ;;  %v4692_v0 = vsel %vm343_vm0, %v335_v19, %v336_v27 }
  0x5f   : > { %1337 = vperm.xlu1 %4029, %v3091_v2   ;;  %1332 = vperm.xlu0 %4028, %v3090_v3   ;;  %v4056_v3 = vld [vmem:[%s6004_s2 + $0x8] sm:$0xff]  }
  0x63   : > { %1285 = vperm.xlu1 %4029, %v3083_v4   ;;  %1280 = vperm.xlu0 %4028, %v3082_v5   ;;  %v4058_v4 = vld [vmem:[%s6004_s2 + $0x50] sm:$0xff]   ;;  %v4710_v5 = vsel %vm343_vm0, %v334_v18, %v335_v19  ;;  %v4757_v18 = vsel %vm464_vm1, %v458_v24, %v459_v32  ;;  %v627_v19 = vpack.c.bf16 %v4617_v35, %v4607_v31 }
  0x67   : > { %1347 = vperm.xlu1 %4029, %v3093_v6   ;;  %1342 = vperm.xlu0 %4028, %v3092_v7   ;;  %v4718_v6 = vsel %vm464_vm1, %v457_v23, %v458_v24  ;;  %v4726_v7 = vsel %vm464_vm1, %v456_v28, %v457_v23  ;;  %v4778_v24 = vsel %vm343_vm0, %v336_v27, %v337_v36  ;;  %v4061_v27 = vld [vmem:[%s6004_s2 + $0x18] sm:$0xff]  }
  0x6b   : > { %1295 = vperm.xlu1 %4029, %v3085_v8   ;;  %1290 = vperm.xlu0 %4028, %v3084_v9  }
  0x6f   : > { %500 = vperm.xlu1 %4029, %v3063_v11   ;;  %495 = vperm.xlu0 %4028, %v3062_v12   ;;  %v4059_v11 = vld [vmem:[%s6004_s2 + $0x10] sm:$0xff]  }
  0x73   : > { %510 = vperm.xlu1 %4029, %v3065_v16   ;;  %505 = vperm.xlu0 %4028, %v3064_v17   ;;  %v4749_v17 = vsel %vm464_vm1, %v459_v32, %v460_v42 }
  0x77   : > { %1357 = vperm.xlu1 %4029, %v3095_v25   ;;  %1352 = vperm.xlu0 %4028, %v3094_v26   ;;  %v4060_v25 = vld [vmem:[%s6004_s2 + $0x58] sm:$0xff]   ;;  %v4770_v26 = vsel %vm343_vm0, %v337_v36, %v338_v41 }
  0x7b   : > { %1305 = vperm.xlu1 %4029, %v3087_v29   ;;  %1300 = vperm.xlu0 %4028, %v3086_v30  }
  0x7f   : > { %1389 = vperm.xlu1 %4029, %v3099_v33   ;;  %1384 = vperm.xlu0 %4028, %v3098_v34   ;;  %v4789_v34 = vld [vmem:[%s4439_s20 + $0x30] sm:$0xff] }
  0x83   : > { %1399 = vperm.xlu1 %4029, %v3101_v37   ;;  %1394 = vperm.xlu0 %4028, %v3100_v40  }
  0x87   : > { %1367 = vperm.xlu1 %4029, %v3097_v43   ;;  %1362 = vperm.xlu0 %4028, %v3096_v44   ;;  %v4062_v43 = vld [vmem:[%s6004_s2 + $0x60] sm:$0xff]   ;;  %v4070_v44 = vld [vmem:[%s6004_s2 + $0x88] sm:$0xff]  }
  0x8b   : > { %1315 = vperm.xlu1 %4029, %v3089_v45   ;;  %1310 = vperm.xlu0 %4028, %v3088_v46   ;;  %v339_v46 = vrot.slane %v4789_v34, 7 }
  0x8f   : > { %1409 = vperm.xlu1 %4029, %v3103_v47   ;;  %1404 = vperm.xlu0 %4028, %v3102_v48   ;;  %v4063_v48 = vld [vmem:[%s6004_s2 + $0x20] sm:$0xff]  }
  0x93   : > { %1419 = vperm.xlu1 %4029, %v3105_v49   ;;  %1414 = vperm.xlu0 %4028, %v3104_v50   ;;  %v628_v49 = vpack.c.bf16 %v4573_v14, %v4789_v34 }
  0x96   : > { %v4654_v51 = vpop.permute.xlu1 %585  ;;  %v4656_v52 = vpop.permute.xlu0 %575 }
  0x97   : > { %v613_v58 = vmul.f32 %v4656_v52, %v4662_v53  ;;  %v615_v38 = vmul.f32 %v4654_v51, %v4710_v5 }
  0x9a   : > { %v4670_v55 = vpop.permute.xlu1 %590  ;;  %v4672_v56 = vpop.permute.xlu0 %580 }
  0x9b   : > { %v614_v59 = vmul.f32 %v4672_v56, %v4668_v54  ;;  %v616_v8 = vmul.f32 %v4670_v55, %v4692_v0 }
  0x9d   : > { %v621_v63 = vpack.c.bf16 %v614_v59, %v613_v58  ;;  %v622_v20 = vpack.c.bf16 %v616_v8, %v615_v38  ;;  %v4822_v58 = vsel %vm343_vm0, %v339_v46, %v340_v21  ;;  %v4828_v59 = vsel %vm343_vm0, %v338_v41, %v339_v46  ;;  %v4065_v21 = vld [vmem:[%s6004_s2 + $0x28] sm:$0xff]  }
  0x9e   : > { %v4694_v1 = vpop.permute.xlu1 %600  ;;  %v4696_v2 = vpop.permute.xlu0 %595 }
  0x9f   : > { %907 = vmatmul.mubr.bf16.vlgmr.msra.gmra.mrb[0].mxu0 %v621_v63  ;;  %v618_v36 = vmul.f32 %v4694_v1, %v4770_v26  ;;  %v617_v37 = vmul.f32 %v4696_v2, %v4778_v24 }
  0xa0   : > { %3503 = vmatpush3.bf16.msra.mxu0 %v4053_v57  ;;  %914 = vmatprep.mubr.bf16.mxu0 %v626_v62  ;;  %v4064_v57 = vld [vmem:[%s6004_s2 + $0x68] sm:$0xff]   ;;  %v4072_v62 = vld [vmem:[%s6004_s2 + $0x90] sm:$0xff]  }
  0xa1   : > { %3504 = vmatprep.subr.bf16.mxu0 %v4055_v60  ;;  %v623_v50 = vpack.c.bf16 %v618_v36, %v617_v37  ;;  %v461_v36 = vrot.slane %v4617_v35, 1  ;;  %v462_v37 = vrot.slane %v4789_v34, 1 }
  0xa2   : > { %v4730_v9 = vpop.permute.xlu1 %636  ;;  %v4732_v10 = vpop.permute.xlu0 %631 }
  0xa3   : > { %v670_v12 = vmul.f32 %v4730_v9, %v4718_v6  ;;  %v669_v16 = vmul.f32 %v4732_v10, %v4726_v7 }
  0xa4   : > { %3505 = vmatpush3.bf16.msra.mxu0 %v4056_v3  ;;  %v4066_v3 = vld [vmem:[%s6004_s2 + $0x70] sm:$0xff]  }
  0xa5   : > { %v677_v23 = vpack.c.bf16 %v670_v12, %v669_v16  ;;  %3506 = vmatprep.subr.bf16.mxu0 %v4058_v4  ;;  %v4073_v12 = vld [vmem:[%s6004_s2 + $0x98] sm:$0xff]   ;;  %v4068_v16 = vld [vmem:[%s6004_s2 + $0x30] sm:$0xff]  }
  0xa6   : > { %v4780_v29 = vpop.permute.xlu1 %646  ;;  %v4782_v30 = vpop.permute.xlu0 %641 }
  0xa7   : > { %v672_v32 = vmul.f32 %v4780_v29, %v4749_v17  ;;  %v671_v33 = vmul.f32 %v4782_v30, %v4757_v18  ;;  %915 = vmatmul.mubr.bf16.gmra.mrb[4].mxu0 %v622_v20  ;;  %3778 = vmatprep.mubr.bf16.mxu1 %v677_v23  ;;  %v4069_v20 = vld [vmem:[%s6004_s2 + $0x78] sm:$0xff]  }
  0xa8   : > { %3507 = vmatpush3.bf16.msra.mxu0 %v4059_v11  ;;  %922 = vmatprep.mubr.bf16.mxu0 %v627_v19 }
  0xa9   : > { %v678_v40 = vpack.c.bf16 %v672_v32, %v671_v33  ;;  %3508 = vmatprep.subr.bf16.mxu0 %v4060_v25  ;;  %v4074_v33 = vld [vmem:[%s6004_s2 + $0xa0] sm:$0xff]  }
  0xaa   : > { %v4804_v45 = vpop.permute.xlu1 %610  ;;  %v4807_v47 = vpop.permute.xlu0 %605 }
  0xab   : > { %3779 = vmatmul.mubr.bf16.vlgmr.msra.gmra.mrb[0].mxu1 %v678_v40  ;;  %v620_v63 = vmul.f32 %v4804_v45, %v4822_v58  ;;  %v619_v41 = vmul.f32 %v4807_v47, %v4828_v59 }
  0xac   : > { %3509 = vmatpush3.bf16.msra.mxu0 %v4061_v27  ;;  %3787 = vmatpush3.bf16.msra.mxu1 %v4524_v61  ;;  %v4071_v27 = vld [vmem:[%s6004_s2 + $0x38] sm:$0xff]  }
  0xad   : > { %3510 = vmatprep.subr.bf16.mxu0 %v4062_v43  ;;  %3788 = vmatprep.subr.bf16.mxu1 %v4070_v44  ;;  %v624_v19 = vpack.c.bf16 %v620_v63, %v619_v41  ;;  %v4905_v63 = vsel %vm464_vm1, %v460_v42, %v461_v36  ;;  %v463_v41 = vrot.slane %v4573_v14, 1 }
  0xae   : > { %v4830_v61 = vpop.permute.xlu1 %411  ;;  %v4832_v60 = vpop.permute.xlu0 %406 }
  0xaf   : > { %6045 = vst [vmem:[#allocation5_spill] sm:$0xff] %v4832_v60  ;;  %923 = vmatmul.mubr.bf16.gmra.mrb[8].mxu0 %v623_v50  ;;  %v445_v4 = vmul.f32 %v4830_v61, %v4457_v39  ;;  %v444_v8 = vmul.f32 %v4832_v60, %v4573_v14  ;;  %v4080_v14 = vld [vmem:[%s6004_s2 + $0xb0] sm:$0xff]  }
  0xb0   : > { %3511 = vmatpush3.bf16.msra.mxu0 %v4063_v48  ;;  %930 = vmatprep.mubr.bf16.mxu0 %v628_v49  ;;  %v4886_v48 = vld [vmem:[%s4439_s20 + $0x8] sm:$0xff] }
  0xb1   : > { %3512 = vmatprep.subr.bf16.mxu0 %v4064_v57  ;;  %3789 = vmatpush3.bf16.msra.mxu1 %v4070_v44  ;;  %v452_v23 = vpack.c.bf16 %v445_v4, %v444_v8  ;;  %v4075_v44 = vld [vmem:[%s6004_s2 + $0x1c0] sm:$0xff]   ;;  %v4078_v8 = vld [vmem:[%s6004_s2 + $0x1c8] sm:$0xff]  }
  0xb2   : > { %v4851_v11 = vpop.permute.xlu1 %359  ;;  %v4853_v38 = vpop.permute.xlu0 %354  ;;  %3790 = vmatprep.subr.bf16.mxu1 %v4072_v62 }
  0xb3   : > { %6046 = vst [vmem:[#allocation6_spill] sm:$0xff] %v4851_v11  ;;  %v393_v40 = vmul.f32 %v4851_v11, %v4662_v53  ;;  %v392_v43 = vmul.f32 %v4853_v38, %v4822_v58 }
  0xb4   : > { %3513 = vmatpush3.bf16.msra.mxu0 %v4065_v21  ;;  %v4899_v21 = vsel %vm464_vm1, %v461_v36, %v462_v37 }
  0xb5   : > { %3514 = vmatprep.subr.bf16.mxu0 %v4066_v3  ;;  %3791 = vmatpush3.bf16.msra.mxu1 %v4072_v62  ;;  %v4077_v62 = vld [vmem:[%s6004_s2 + $0xa8] sm:$0xff]   ;;  %v4076_v3 = vld [vmem:[%s6004_s2 + $0x180] sm:$0xff]   ;;  %v400_v4 = vpack.c.bf16 %v393_v40, %v392_v43 }
  0xb6   : > { %v4864_v25 = vpop.permute.xlu1 %421  ;;  %v4866_v32 = vpop.permute.xlu0 %416  ;;  %3792 = vmatprep.subr.bf16.mxu1 %v4073_v12 }
  0xb7   : > { %931 = vmatmul.mubr.bf16.gmra.mrb[12].mxu0 %v624_v19  ;;  %v447_v46 = vmul.f32 %v4864_v25, %v4570_v13  ;;  %v446_v49 = vmul.f32 %v4886_v48, %v4866_v32 }
  0xb8   : > { %3515 = vmatpush3.bf16.msra.mxu0 %v4068_v16  ;;  %1180 = vmatprep.mubr.bf16.mxu0 %v452_v23  ;;  %v4929_v23 = vsel %vm464_vm1, %v463_v41, %v456_v28  ;;  %v4081_v28 = vld [vmem:[%s6004_s2 + $0x1d0] sm:$0xff]  }
  0xb9   : > { %3516 = vmatprep.subr.bf16.mxu0 %v4069_v20  ;;  %3793 = vmatpush3.bf16.msra.mxu1 %v4073_v12  ;;  %v453_v12 = vpack.c.bf16 %v447_v46, %v446_v49 }
  0xba   : > { %v4890_v50 = vpop.permute.xlu1 %369  ;;  %v4892_v57 = vpop.permute.xlu0 %364  ;;  %3794 = vmatprep.subr.bf16.mxu1 %v4074_v33 }
  0xbb   : > { %v395_v36 = vmul.f32 %v4890_v50, %v4710_v5  ;;  %v394_v40 = vmul.f32 %v4892_v57, %v4668_v54 }
  0xbc   : > { %3517 = vmatpush3.bf16.msra.mxu0 %v4071_v27  ;;  %v4079_v27 = vld [vmem:[%s6004_s2 + $0x188] sm:$0xff]  }
  0xbd   : > { %3554 = vmatprep.subr.bf16.mxu0 %v4075_v44  ;;  %3795 = vmatpush3.bf16.msra.mxu1 %v4074_v33  ;;  %v4933_v33 = vsel %vm464_vm1, %v462_v37, %v463_v41  ;;  %v4083_v44 = vld [vmem:[%s6004_s2 + $0xb8] sm:$0xff]   ;;  %v401_v41 = vpack.c.bf16 %v395_v36, %v394_v40  ;;  %v4086_v40 = vld [vmem:[%s6004_s2 + $0x1e0] sm:$0xff]  }
  0xbe   : > { %v4914_v16 = vpop.permute.xlu1 %656  ;;  %v4916_v19 = vpop.permute.xlu0 %651  ;;  %3796 = vmatprep.subr.bf16.mxu1 %v4077_v62 }
  0xbf   : > { %v674_v42 = vmul.f32 %v4914_v16, %v4899_v21  ;;  %v673_v20 = vmul.f32 %v4916_v19, %v4905_v63  ;;  %1181 = vmatmul.mubr.bf16.vlgmr.msra.gmra.mrb[16].mxu0 %v400_v4  ;;  %v4084_v4 = vld [vmem:[%s6004_s2 + $0x1d8] sm:$0xff]  }
  0xc0   : > { %1188 = vmatprep.mubr.bf16.mxu0 %v453_v12  ;;  %3555 = vmatpush3.bf16.msra.mxu0 %v4076_v3 }
  0xc1   : > { %v679_v39 = vpack.c.bf16 %v674_v42, %v673_v20  ;;  %3556 = vmatprep.subr.bf16.mxu0 %v4078_v8  ;;  %3797 = vmatpush3.bf16.msra.mxu1 %v4077_v62  ;;  %v4082_v62 = vld [vmem:[%s6004_s2 + $0x190] sm:$0xff]   ;;  %v4094_v42 = vld [vmem:[%s6004_s2 + $0x200] sm:$0xff]  }
  0xc2   : > { %v4945_v37 = vpop.permute.xlu1 %666  ;;  %v4947_v43 = vpop.permute.xlu0 %661  ;;  %3798 = vmatprep.subr.bf16.mxu1 %v4080_v14 }
  0xc3   : > { %v676_v46 = vmul.f32 %v4945_v37, %v4929_v23  ;;  %v675_v49 = vmul.f32 %v4947_v43, %v4933_v33  ;;  %3782 = vmatprep.mubr.bf16.mxu1 %v679_v39 }
  0xc4   : > { %3557 = vmatpush3.bf16.msra.mxu0 %v4079_v27 }
  0xc5   : > { %v680_v3 = vpack.c.bf16 %v676_v46, %v675_v49  ;;  %3558 = vmatprep.subr.bf16.mxu0 %v4081_v28  ;;  %3799 = vmatpush3.bf16.msra.mxu1 %v4080_v14  ;;  %v4085_v14 = vld [vmem:[%s6004_s2 + $0x198] sm:$0xff]  }
  0xc6   : > { %v4962_v8 = vpop.permute.xlu1 %431  ;;  %v4964_v12 = vpop.permute.xlu0 %426  ;;  %3800 = vmatprep.subr.bf16.mxu1 %v4083_v44 }
  0xc7   : > { %6047 = vst [vmem:[#allocation7_spill] sm:$0xff] %v4962_v8  ;;  %v449_v20 = vmul.f32 %v4962_v8, %v4607_v31  ;;  %v448_v27 = vmul.f32 %v4964_v12, %v4588_v22  ;;  %3783 = vmatmul.mubr.bf16.gmra.mrb[4].mxu1 %v680_v3  ;;  %1189 = vmatmul.mubr.bf16.gmra.mrb[20].mxu0 %v401_v41  ;;  %v4088_v41 = vld [vmem:[%s6004_s2 + $0x1e8] sm:$0xff]  }
  0xc8   : > { %3559 = vmatpush3.bf16.msra.mxu0 %v4082_v62 }
  0xc9   : > { %v454_v36 = vpack.c.bf16 %v449_v20, %v448_v27  ;;  %3560 = vmatprep.subr.bf16.mxu0 %v4084_v4  ;;  %3801 = vmatpush3.bf16.msra.mxu1 %v4083_v44  ;;  %v4087_v44 = vld [vmem:[%s6004_s2 + $0x1a0] sm:$0xff]  }
  0xca   : > { %v4979_v39 = vpop.permute.xlu1 %379  ;;  %v4981_v28 = vpop.permute.xlu0 %374  ;;  %3810 = vmatprep.subr.bf16.mxu1 %v4094_v42 }
  0xcb   : > { %6048 = vst [vmem:[#allocation8_spill] sm:$0xff] %v4979_v39  ;;  %6049 = vst [vmem:[#allocation9_spill] sm:$0xff] %v4981_v28  ;;  %v397_v46 = vmul.f32 %v4979_v39, %v4778_v24  ;;  %v396_v49 = vmul.f32 %v4981_v28, %v4692_v0  ;;  %1196 = vmatprep.mubr.bf16.mxu0 %v454_v36 }
  0xcc   : > { %3561 = vmatpush3.bf16.msra.mxu0 %v4085_v14  ;;  %v4089_v14 = vld [vmem:[%s6004_s2 + $0x1a8] sm:$0xff]  }
  0xcd   : > { %v402_v62 = vpack.c.bf16 %v397_v46, %v396_v49  ;;  %3562 = vmatprep.subr.bf16.mxu0 %v4086_v40  ;;  %v4090_v40 = vld [vmem:[%s6004_s2 + $0x1f0] sm:$0xff]  }
  0xce   : > { %v4993_v3 = vpop.permute.xlu1 %480  ;;  %v4995_v4 = vpop.permute.xlu0 %475 }
  0xcf   : > { %v514_v20 = vmul.f32 %v4993_v3, %v4726_v7  ;;  %v513_v27 = vmul.f32 %v4995_v4, %v4929_v23  ;;  %1197 = vmatmul.mubr.bf16.gmra.mrb[24].mxu0 %v402_v62  ;;  %v4091_v62 = vld [vmem:[%s6004_s2 + $0x1b0] sm:$0xff]  }
  0xd0   : > { %3563 = vmatpush3.bf16.msra.mxu0 %v4087_v44 }
  0xd1   : > { %v521_v36 = vpack.c.bf16 %v514_v20, %v513_v27  ;;  %3564 = vmatprep.subr.bf16.mxu0 %v4088_v41  ;;  %v4092_v20 = vld [vmem:[%s6004_s2 + $0x1f8] sm:$0xff]   ;;  %v4095_v27 = vld [vmem:[%s6004_s2 + $0x208] sm:$0xff]  }
  0xd2   : > { %v5007_v46 = vpop.permute.xlu1 %490  ;;  %v5009_v49 = vpop.permute.xlu0 %485 }
  0xd3   : > { %v516_v39 = vmul.f32 %v5007_v46, %v4757_v18  ;;  %v515_v44 = vmul.f32 %v5009_v49, %v4718_v6  ;;  %3802 = vmatprep.mubr.bf16.mxu1 %v521_v36 }
  0xd4   : > { %3565 = vmatpush3.bf16.msra.mxu0 %v4089_v14 }
  0xd5   : > { %v522_v41 = vpack.c.bf16 %v516_v39, %v515_v44  ;;  %3566 = vmatprep.subr.bf16.mxu0 %v4090_v40  ;;  %v4093_v39 = vld [vmem:[%s6004_s2 + $0x1b8] sm:$0xff]   ;;  %v4096_v44 = vld [vmem:[%s6004_s2 + $0x210] sm:$0xff]  }
  0xd6   : > { %v5024_v28 = vpop.permute.xlu1 %441  ;;  %v5026_v8 = vpop.permute.xlu0 %436 }
  0xd7   : > { %6050 = vst [vmem:[#allocation10_spill] sm:$0xff] %v5024_v28  ;;  %6051 = vst [vmem:[#allocation11_spill] sm:$0xff] %v5026_v8  ;;  %v451_v14 = vmul.f32 %v5024_v28, %v4789_v34  ;;  %v450_v36 = vmul.f32 %v5026_v8, %v4617_v35  ;;  %3803 = vmatmul.mubr.bf16.vlgmr.msra.gmra.mrb[0].mxu1 %v522_v41 }
  0xd8   : > { %3567 = vmatpush3.bf16.msra.mxu0 %v4091_v62  ;;  %3811 = vmatpush3.bf16.msra.mxu1 %v4094_v42 }
  0xd9   : > { %v455_v40 = vpack.c.bf16 %v451_v14, %v450_v36  ;;  %3568 = vmatprep.subr.bf16.mxu0 %v4092_v20  ;;  %3812 = vmatprep.subr.bf16.mxu1 %v4095_v27  ;;  %v4097_v20 = vld [vmem:[%s6004_s2 + $0x218] sm:$0xff]  }
  0xda   : > { %v5038_v11 = vpop.permute.xlu1 %389  ;;  %v5040_v28 = vpop.permute.xlu0 %384 }
  0xdb   : > { %6052 = vst [vmem:[#allocation12_spill] sm:$0xff] %v5038_v11  ;;  %6053 = vst [vmem:[#allocation13_spill] sm:$0xff] %v5040_v28  ;;  %v399_v41 = vmul.f32 %v5038_v11, %v4828_v59  ;;  %v398_v62 = vmul.f32 %v5040_v28, %v4770_v26  ;;  %1204 = vmatprep.mubr.bf16.mxu0 %v455_v40 }
  0xdc   : > { %3569 = vmatpush3.bf16.msra.mxu0 %v4093_v39  ;;  %3813 = vmatpush3.bf16.msra.mxu1 %v4095_v27  ;;  %v4098_v27 = vld [vmem:[%s6004_s2 + $0x220] sm:$0xff]  }
  0xdd   : > { %v403_v42 = vpack.c.bf16 %v399_v41, %v398_v62  ;;  %3814 = vmatprep.subr.bf16.mxu1 %v4096_v44 }
  0xde   : > { %v5049_v14 = vpop.permute.xlu1 %1337  ;;  %v5051_v36 = vpop.permute.xlu0 %1332 }
  0xdf   : > { %6054 = vst [vmem:[#allocation14_spill] sm:$0xff] %v5049_v14  ;;  %6055 = vst [vmem:[#allocation15_spill] sm:$0xff] %v5051_v36  ;;  %v1371_v8 = vmul.f32 %v5049_v14, %v4570_v13  ;;  %v1370_v11 = vmul.f32 %v4886_v48, %v5051_v36  ;;  %1205 = vmatmul.mubr.bf16.gmra.mrb[28].mxu0 %v403_v42 }
  0xe0   : > { %3815 = vmatpush3.bf16.msra.mxu1 %v4096_v44 }
  0xe1   : > { %v1378_v39 = vpack.c.bf16 %v1371_v8, %v1370_v11  ;;  %3816 = vmatprep.subr.bf16.mxu1 %v4097_v20  ;;  %v4099_v11 = vld [vmem:[%s6004_s2 + $0x228] sm:$0xff]  }
  0xe2   : > { %v5060_v40 = vpop.permute.xlu1 %1285  ;;  %v5062_v41 = vpop.permute.xlu0 %1280 }
  0xe3   : > { %6056 = vst [vmem:[#allocation16_spill] sm:$0xff] %v5062_v41  ;;  %v1319_v62 = vmul.f32 %v5060_v40, %v4710_v5  ;;  %v1318_v13 = vmul.f32 %v5062_v41, %v4668_v54  ;;  %1659 = vmatprep.mubr.bf16.mxu0 %v1378_v39 }
  0xe4   : > { %3817 = vmatpush3.bf16.msra.mxu1 %v4097_v20  ;;  %v4100_v20 = vld [vmem:[%s6004_s2 + $0x230] sm:$0xff]  }
  0xe5   : > { %v1326_v48 = vpack.c.bf16 %v1319_v62, %v1318_v13  ;;  %3818 = vmatprep.subr.bf16.mxu1 %v4098_v27 }
  0xe6   : > { %v5071_v8 = vpop.permute.xlu1 %1347  ;;  %v5073_v44 = vpop.permute.xlu0 %1342 }
  0xe7   : > { %6057 = vst [vmem:[#allocation17_spill] sm:$0xff] %v5071_v8  ;;  %6058 = vst [vmem:[#allocation18_spill] sm:$0xff] %v5073_v44  ;;  %v1373_v42 = vmul.f32 %v5071_v8, %v4607_v31  ;;  %v1372_v5 = vmul.f32 %v5073_v44, %v4588_v22  ;;  %1660 = vmatmul.mubr.bf16.vlgmr.msra.gmra.mrb[32].mxu0 %v1326_v48 }
  0xe8   : > { %3819 = vmatpush3.bf16.msra.mxu1 %v4098_v27  ;;  %v4101_v27 = vld [vmem:[%s6004_s2 + $0x238] sm:$0xff]  }
  0xe9   : > { %v1379_v54 = vpack.c.bf16 %v1373_v42, %v1372_v5  ;;  %3820 = vmatprep.subr.bf16.mxu1 %v4099_v11 }
  0xea   : > { %v5082_v39 = vpop.permute.xlu1 %1295  ;;  %v5084_v62 = vpop.permute.xlu0 %1290 }
  0xeb   : > { %6059 = vst [vmem:[#allocation19_spill] sm:$0xff] %v5082_v39  ;;  %6060 = vst [vmem:[#allocation20_spill] sm:$0xff] %v5084_v62  ;;  %v1321_v13 = vmul.f32 %v5082_v39, %v4778_v24  ;;  %v1320_v31 = vmul.f32 %v5084_v62, %v4692_v0  ;;  %1667 = vmatprep.mubr.bf16.mxu0 %v1379_v54 }
  0xec   : > { %3821 = vmatpush3.bf16.msra.mxu1 %v4099_v11 }
  0xed   : > { %v1327_v22 = vpack.c.bf16 %v1321_v13, %v1320_v31  ;;  %3822 = vmatprep.subr.bf16.mxu1 %v4100_v20 }
  0xee   : > { %v5093_v48 = vpop.permute.xlu1 %500  ;;  %v5095_v42 = vpop.permute.xlu0 %495 }
  0xef   : > { %6061 = vst [vmem:[#allocation21_spill] sm:$0xff] %v5093_v48  ;;  %6062 = vst [vmem:[#allocation22_spill] sm:$0xff] %v5095_v42  ;;  %v518_v5 = vmul.f32 %v5093_v48, %v4905_v63  ;;  %v517_v24 = vmul.f32 %v5095_v42, %v4749_v17  ;;  %1668 = vmatmul.mubr.bf16.gmra.mrb[36].mxu0 %v1327_v22 }
  0xf0   : > { %3823 = vmatpush3.bf16.msra.mxu1 %v4100_v20 }
  0xf1   : > { %v523_v0 = vpack.c.bf16 %v518_v5, %v517_v24  ;;  %3824 = vmatprep.subr.bf16.mxu1 %v4101_v27 }
  0xf2   : > { %v5101_v11 = vpop.permute.xlu1 %510  ;;  %v5103_v54 = vpop.permute.xlu0 %505 }
  0xf3   : > { %6063 = vst [vmem:[#allocation23_spill] sm:$0xff] %v5101_v11  ;;  %6064 = vst [vmem:[#allocation24_spill] sm:$0xff] %v5103_v54  ;;  %v520_v13 = vmul.f32 %v5101_v11, %v4933_v33  ;;  %v519_v31 = vmul.f32 %v5103_v54, %v4899_v21  ;;  %3806 = vmatprep.mubr.bf16.mxu1 %v523_v0 }
  0xf4   : > { %3825 = vmatpush3.bf16.msra.mxu1 %v4101_v27 }
  0xf5   : > { %v524_v39 = vpack.c.bf16 %v520_v13, %v519_v31 }
  0xf6   : > { %v5109_v62 = vpop.permute.xlu1 %1357  ;;  %v5111_v8 = vpop.permute.xlu0 %1352 }
  0xf7   : > { %6065 = vst [vmem:[#allocation25_spill] sm:$0xff] %v5109_v62  ;;  %6066 = vst [vmem:[#allocation26_spill] sm:$0xff] %v5111_v8  ;;  %v1375_v20 = vmul.f32 %v5109_v62, %v4789_v34  ;;  %v1374_v22 = vmul.f32 %v5111_v8, %v4617_v35  ;;  %3807 = vmatmul.mubr.bf16.gmra.mrb[4].mxu1 %v524_v39 }
  0xf9   : > { %v1380_v5 = vpack.c.bf16 %v1375_v20, %v1374_v22 }
  0xfa   : > { %v5117_v24 = vpop.permute.xlu1 %1305  ;;  %v5119_v44 = vpop.permute.xlu0 %1300 }
  0xfb   : > { %6067 = vst [vmem:[#allocation27_spill] sm:$0xff] %v5117_v24  ;;  %6068 = vst [vmem:[#allocation28_spill] sm:$0xff] %v5119_v44  ;;  %v1323_v27 = vmul.f32 %v5117_v24, %v4828_v59  ;;  %v1322_v0 = vmul.f32 %v5119_v44, %v4770_v26  ;;  %1675 = vmatprep.mubr.bf16.mxu0 %v1380_v5  ;;  %v4175_v24 = vld [vmem:[%s4439_s20] sm:$0xff] }
  0xfd   : > { %v1328_v13 = vpack.c.bf16 %v1323_v27, %v1322_v0 }
  0xfe   : > { %v5125_v31 = vpop.permute.xlu1 %1389  ;;  %v5127_v34 = vpop.permute.xlu0 %1384 }
  0xff   : > { %v1423_v35 = vmul.f32 %v5125_v31, %v4757_v18  ;;  %v1422_v39 = vmul.f32 %v5127_v34, %v4718_v6  ;;  %1676 = vmatmul.mubr.bf16.gmra.mrb[40].mxu0 %v1328_v13  ;;  %v4176_v13 = vld [vmem:[%s4439_s20 + $0x38] sm:$0xff] }
 0x101   : > { %v1430_v20 = vpack.c.bf16 %v1423_v35, %v1422_v39 }
 0x102   : > { %v5133_v59 = vpop.permute.xlu1 %1399  ;;  %v5135_v22 = vpop.permute.xlu0 %1394 }
 0x103   : > { %6069 = vst [vmem:[#allocation29_spill] sm:$0xff] %v5135_v22  ;;  %v1425_v26 = vmul.f32 %v5133_v59, %v4905_v63  ;;  %v1424_v5 = vmul.f32 %v5135_v22, %v4749_v17  ;;  %3826 = vmatprep.mubr.bf16.mxu1 %v1430_v20 }
 0x105   : > { %v1431_v27 = vpack.c.bf16 %v1425_v26, %v1424_v5 }
 0x106   : > { %v5141_v0 = vpop.permute.xlu1 %1367  ;;  %v5143_v18 = vpop.permute.xlu0 %1362 }
 0x107   : > { %6070 = vst [vmem:[#allocation30_spill] sm:$0xff] %v5141_v0  ;;  %6071 = vst [vmem:[#allocation31_spill] sm:$0xff] %v5143_v18  ;;  %v1377_v6 = vmul.f32 %v4175_v24, %v5141_v0  ;;  %v1376_v35 = vmul.f32 %v4176_v13, %v5143_v18  ;;  %3827 = vmatmul.mubr.bf16.vlgmr.msra.gmra.mrb[0].mxu1 %v1431_v27 }
 0x109   : > { %v1381_v39 = vpack.c.bf16 %v1377_v6, %v1376_v35 }
 0x10a   : > { %v5149_v44 = vpop.permute.xlu1 %1315  ;;  %v5151_v63 = vpop.permute.xlu0 %1310 }
 0x10b   : > { %6072 = vst [vmem:[#allocation32_spill] sm:$0xff] %v5149_v44  ;;  %6073 = vst [vmem:[#allocation33_spill] sm:$0xff] %v5151_v63  ;;  %v1325_v17 = vmul.f32 %v5149_v44, %v4662_v53  ;;  %v1324_v20 = vmul.f32 %v5151_v63, %v4822_v58  ;;  %1683 = vmatprep.mubr.bf16.mxu0 %v1381_v39 }
 0x10d   : > { %v1329_v26 = vpack.c.bf16 %v1325_v17, %v1324_v20  ;;  %v4106_v20 = vld [vmem:[%s6006_s4 + $0x108] sm:$0xff]  }
 0x10e   : > { %v5157_v5 = vpop.permute.xlu1 %1409  ;;  %v5159_v24 = vpop.permute.xlu0 %1404 }
 0x10f   : > { %6074 = vst [vmem:[#allocation34_spill] sm:$0xff] %v5157_v5  ;;  %6075 = vst [vmem:[#allocation35_spill] sm:$0xff] %v5159_v24  ;;  %v1427_v27 = vmul.f32 %v5157_v5, %v4933_v33  ;;  %v1426_v6 = vmul.f32 %v5159_v24, %v4899_v21  ;;  %1684 = vmatmul.mubr.bf16.gmra.mrb[44].mxu0 %v1329_v26  ;;  %v4102_v33 = vld [vmem:[%s6006_s4 + $0x140] sm:$0xff]   ;;  %v4107_v26 = vld [vmem:[%s6006_s4 + $0xc8] sm:$0xff]  }
 0x110   : > { %3834 = vmatprep.subr.bf16.mxu1 %v4102_v33  ;;  %v4103_v21 = vld [vmem:[%s6006_s4 + $0x100] sm:$0xff]  }
 0x111   : > { %v1432_v13 = vpack.c.bf16 %v1427_v27, %v1426_v6  ;;  %3835 = vmatpush3.bf16.msra.mxu1 %v4102_v33  ;;  %3606 = vmatprep.subr.bf16.mxu0 %v4103_v21  ;;  %v4108_v27 = vld [vmem:[%s6006_s4 + $0x150] sm:$0xff]   ;;  %v4114_v33 = vld [vmem:[%s6006_s4 + $0x160] sm:$0xff]  }
 0x112   : > { %v5165_v35 = vpop.permute.xlu1 %1419  ;;  %v5167_v53 = vpop.permute.xlu0 %1414  ;;  %v4109_v6 = vld [vmem:[%s6006_s4 + $0x110] sm:$0xff]   ;;  %v4115_v21 = vld [vmem:[%s6006_s4 + $0x120] sm:$0xff]  }
 0x113   : > { %6076 = vst [vmem:[#allocation36_spill] sm:$0xff] %v5165_v35  ;;  %6077 = vst [vmem:[#allocation37_spill] sm:$0xff] %v5167_v53  ;;  %v1429_v58 = vmul.f32 %v5165_v35, %v4726_v7  ;;  %v1428_v39 = vmul.f32 %v5167_v53, %v4929_v23  ;;  %3830 = vmatprep.mubr.bf16.mxu1 %v1432_v13  ;;  %v4104_v7 = vld [vmem:[%s6006_s4 + $0xc0] sm:$0xff]   ;;  %v4105_v23 = vld [vmem:[%s6006_s4 + $0x148] sm:$0xff]  }
 0x114   : > { %3607 = vmatpush3.bf16.msra.mxu0 %v4104_v7  ;;  %3836 = vmatprep.subr.bf16.mxu1 %v4105_v23  ;;  %v4110_v13 = vld [vmem:[%s6006_s4 + $0xd0] sm:$0xff]   ;;  %v4116_v7 = vld [vmem:[%s6006_s4 + $0xe0] sm:$0xff]  }
 0x115   : > { %v1433_v17 = vpack.c.bf16 %v1429_v58, %v1428_v39  ;;  %3837 = vmatpush3.bf16.msra.mxu1 %v4105_v23  ;;  %3608 = vmatprep.subr.bf16.mxu0 %v4106_v20  ;;  %v4111_v58 = vld [vmem:[%s6006_s4 + $0x158] sm:$0xff]   ;;  %v4117_v23 = vld [vmem:[%s6006_s4 + $0x168] sm:$0xff]  }
 0x116   : > { %3838 = vmatprep.subr.bf16.mxu1 %v4108_v27  ;;  %v4112_v39 = vld [vmem:[%s6006_s4 + $0x118] sm:$0xff]   ;;  %v4118_v20 = vld [vmem:[%s6006_s4 + $0x128] sm:$0xff]  }
 0x117   : > { %3831 = vmatmul.mubr.bf16.gmra.mrb[4].mxu1 %v1433_v17  ;;  %v4113_v17 = vld [vmem:[%s6006_s4 + $0xd8] sm:$0xff]  }
 0x118   : > { %3609 = vmatpush3.bf16.msra.mxu0 %v4107_v26  ;;  %v4119_v26 = vld [vmem:[%s6006_s4 + $0xe8] sm:$0xff]  }
 0x119   : > { %3839 = vmatpush3.bf16.msra.mxu1 %v4108_v27  ;;  %3610 = vmatprep.subr.bf16.mxu0 %v4109_v6  ;;  %v4120_v27 = vld [vmem:[%s6006_s4 + $0x170] sm:$0xff]  }
 0x11a   : > { %3840 = vmatprep.subr.bf16.mxu1 %v4111_v58  ;;  %v4121_v6 = vld [vmem:[%s6006_s4 + $0x130] sm:$0xff]  }
 0x11c   : > { %3611 = vmatpush3.bf16.msra.mxu0 %v4110_v13 }
 0x11d   : > { %3841 = vmatpush3.bf16.msra.mxu1 %v4111_v58  ;;  %3612 = vmatprep.subr.bf16.mxu0 %v4112_v39  ;;  %v4122_v58 = vld [vmem:[%s6006_s4 + $0xf0] sm:$0xff]  }
 0x11e   : > { %3842 = vmatprep.subr.bf16.mxu1 %v4114_v33 }
 0x120   : > { %3613 = vmatpush3.bf16.msra.mxu0 %v4113_v17  ;;  %v4123_v17 = vld [vmem:[%s6006_s4 + $0x178] sm:$0xff]  }
 0x121   : > { %3843 = vmatpush3.bf16.msra.mxu1 %v4114_v33  ;;  %3614 = vmatprep.subr.bf16.mxu0 %v4115_v21 }
 0x122   : > { %3844 = vmatprep.subr.bf16.mxu1 %v4117_v23 }
 0x124   : > { %3615 = vmatpush3.bf16.msra.mxu0 %v4116_v7  ;;  %v4124_v7 = vld [vmem:[%s6006_s4 + $0x138] sm:$0xff]  }
 0x125   : > { %3845 = vmatpush3.bf16.msra.mxu1 %v4117_v23  ;;  %3616 = vmatprep.subr.bf16.mxu0 %v4118_v20  ;;  %v4125_v23 = vld [vmem:[%s6006_s4 + $0xf8] sm:$0xff]   ;;  %v5248_v20 = vld [vmem:[%s6006_s4 + $0x80] sm:$0xff]  }
 0x126   : > { %3846 = vmatprep.subr.bf16.mxu1 %v4120_v27 }
 0x128   : > { %3617 = vmatpush3.bf16.msra.mxu0 %v4119_v26 }
 0x129   : > { %3847 = vmatpush3.bf16.msra.mxu1 %v4120_v27  ;;  %3618 = vmatprep.subr.bf16.mxu0 %v4121_v6  ;;  %v4127_v6 = vld [vmem:[%s6006_s4 + $0x40] sm:$0xff]  }
 0x12a   : > { %3848 = vmatprep.subr.bf16.mxu1 %v4123_v17 }
 0x12c   : > { %3619 = vmatpush3.bf16.msra.mxu0 %v4122_v58 }
 0x12d   : > { %3620 = vmatprep.subr.bf16.mxu0 %v4124_v7  ;;  %3849 = vmatpush3.bf16.msra.mxu1 %v4123_v17 }
 0x12e   : > { %3858 = vmatprep.subr.bf16.mxu1 %v5248_v20 }
 0x130   : > { %3621 = vmatpush3.bf16.msra.mxu0 %v4125_v23 }
 0x131   : > { %3658 = vmatprep.subr.bf16.mxu0 %v4127_v6 }
 0x172   : > { %v3466_v13 = vpop.f32.mrb[0].mxu0 }
 0x173   : > { %v3467_v39 = vpop.f32.mrb[1].mxu0 }
 0x174   : > { %v3468_v33 = vadd.f32 %v3467_v39, %v3466_v13  ;;  %v3469_v21 = vpop.f32.mrb[2].mxu0 }
 0x175   : > { %v3470_v26 = vpop.f32.mrb[3].mxu0 }
 0x176   : > { %v3471_v27 = vadd.f32 %v3470_v26, %v3469_v21 }
 0x17a   : > { %v3472_v13 = vpop.f32.mrb[4].mxu0 }
 0x17b   : > { %v3473_v58 = vpop.f32.mrb[5].mxu0 }
 0x17c   : > { %v3474_v39 = vadd.f32 %v3473_v58, %v3472_v13  ;;  %v3475_v44 = vpop.f32.mrb[6].mxu0 }
 0x17d   : > { %v3476_v63 = vpop.f32.mrb[7].mxu0 }
 0x17e   : > { %v3477_v0 = vadd.f32 %v3476_v63, %v3475_v44 }
 0x182   : > { %v3478_v18 = vpop.f32.mrb[8].mxu0 }
 0x183   : > { %v3479_v62 = vpop.f32.mrb[9].mxu0 }
 0x184   : > { %v3480_v8 = vadd.f32 %v3479_v62, %v3478_v18  ;;  %v3481_v21 = vpop.f32.mrb[10].mxu0 }
 0x185   : > { %v3482_v7 = vpop.f32.mrb[11].mxu0 }
 0x186   : > { %v3483_v17 = vadd.f32 %v3482_v7, %v3481_v21 }
 0x18a   : > { %v3484_v26 = vpop.f32.mrb[12].mxu0 }
 0x18b   : > { %v3485_v35 = vpop.f32.mrb[13].mxu0 }
 0x18c   : > { %v3486_v23 = vadd.f32 %v3485_v35, %v3484_v26  ;;  %v3487_v53 = vpop.f32.mrb[14].mxu0 }
 0x18d   : > { %v3488_v41 = vpop.f32.mrb[15].mxu0 }
 0x18e   : > { %v3489_v5 = vadd.f32 %v3488_v41, %v3487_v53 }
 0x192   : > { %v3518_v24 = vpop.f32.mrb[16].mxu0 }
 0x193   : > { %v3519_v22 = vpop.f32.mrb[17].mxu0 }
 0x194   : > { %v3520_v14 = vadd.f32 %v3519_v22, %v3518_v24  ;;  %v3521_v6 = vpop.f32.mrb[18].mxu0 }
 0x195   : > { %v3522_v13 = vpop.f32.mrb[19].mxu0 }
 0x196   : > { %v3909_v58 = vadd.f32 %v3520_v14, %v3468_v33  ;;  %v3523_v36 = vadd.f32 %v3522_v13, %v3521_v6 }
 0x198   : > { %v3915_v44 = vadd.f32 %v3523_v36, %v3471_v27 }
 0x19a   : > { %v3524_v63 = vpop.f32.mrb[20].mxu0 }
 0x19b   : > { %v3525_v28 = vpop.f32.mrb[21].mxu0 }
 0x19c   : > { %v3526_v62 = vadd.f32 %v3525_v28, %v3524_v63  ;;  %v3527_v18 = vpop.f32.mrb[22].mxu0 }
 0x19d   : > { %v3528_v11 = vpop.f32.mrb[23].mxu0 }
 0x19e   : > { %v3906_v21 = vadd.f32 %v3526_v62, %v3474_v39  ;;  %v3529_v7 = vadd.f32 %v3528_v11, %v3527_v18 }
 0x1a0   : > { %v3912_v54 = vadd.f32 %v3529_v7, %v3477_v0 }
 0x1a2   : > { %v3530_v35 = vpop.f32.mrb[24].mxu0 }
 0x1a3   : > { %v3531_v26 = vpop.f32.mrb[25].mxu0 }
 0x1a4   : > { %v3532_v48 = vadd.f32 %v3531_v26, %v3530_v35  ;;  %v3533_v41 = vpop.f32.mrb[26].mxu0 }
 0x1a5   : > { %v3534_v53 = vpop.f32.mrb[27].mxu0 }
 0x1a6   : > { %v3921_v42 = vadd.f32 %v3532_v48, %v3480_v8  ;;  %v3535_v22 = vadd.f32 %v3534_v53, %v3533_v41 }
 0x1a8   : > { %v3927_v24 = vadd.f32 %v3535_v22, %v3483_v17 }
 0x1b2   : > { %v3536_v60 = vpop.f32.mrb[28].mxu0 }
 0x1b3   : > { %v3537_v14 = vpop.f32.mrb[29].mxu0 }
 0x1b4   : > { %v3538_v33 = vadd.f32 %v3537_v14, %v3536_v60  ;;  %v3539_v36 = vpop.f32.mrb[30].mxu0 }
 0x1b5   : > { %v3540_v27 = vpop.f32.mrb[31].mxu0 }
 0x1b6   : > { %v5254_v6 = vadd.f32 %v3538_v33, %v3486_v23  ;;  %v3541_v28 = vadd.f32 %v3540_v27, %v3539_v36 }
 0x1b8   : > { %v5256_v13 = vadd.f32 %v3541_v28, %v3489_v5 }
 0x1ba   : > { %v3570_v11 = vpop.f32.mrb[32].mxu0 }
 0x1bb   : > { %v3571_v0 = vpop.f32.mrb[33].mxu0 }
 0x1bc   : > { %v3572_v39 = vadd.f32 %v3571_v0, %v3570_v11  ;;  %v3573_v63 = vpop.f32.mrb[34].mxu0 }
 0x1bd   : > { %v3574_v62 = vpop.f32.mrb[35].mxu0 }
 0x1be   : > { %v3575_v18 = vadd.f32 %v3574_v62, %v3573_v63  ;;  %v3910_v7 = vadd.f32 %v3909_v58, %v3572_v39 }
 0x1c0   : > { %v3916_v8 = vadd.f32 %v3915_v44, %v3575_v18  ;;  %v5265_v44 = vld [vmem:[%s6005_s3] ss:$0 sm:$0xff] }
 0x1c2   : > { %v3576_v48 = vpop.f32.mrb[36].mxu0 }
 0x1c3   : > { %v3577_v17 = vpop.f32.mrb[37].mxu0 }
 0x1c4   : > { %v3578_v35 = vadd.f32 %v3577_v17, %v3576_v48  ;;  %v3579_v26 = vpop.f32.mrb[38].mxu0 }
 0x1c5   : > { %v3580_v60 = vpop.f32.mrb[39].mxu0 }
 0x1c6   : > { %v3581_v41 = vadd.f32 %v3580_v60, %v3579_v26  ;;  %v3907_v53 = vadd.f32 %v3906_v21, %v3578_v35 }
 0x1c8   : > { %v3913_v23 = vadd.f32 %v3912_v54, %v3581_v41 }
 0x1d2   : > { %v3582_v22 = vpop.f32.mrb[40].mxu0 }
 0x1d3   : > { %v3583_v14 = vpop.f32.mrb[41].mxu0 }
 0x1d4   : > { %v3584_v5 = vadd.f32 %v3583_v14, %v3582_v22  ;;  %v3585_v33 = vpop.f32.mrb[42].mxu0 }
 0x1d5   : > { %v3586_v36 = vpop.f32.mrb[43].mxu0 }
 0x1d6   : > { %v3587_v27 = vadd.f32 %v3586_v36, %v3585_v33  ;;  %v5258_v28 = vadd.f32 %v3921_v42, %v3584_v5 }
 0x1d8   : > { %v5260_v11 = vadd.f32 %v3927_v24, %v3587_v27 }
 0x1da   : > { %v3828_v58 = vpop.f32.mrb[0].mxu1 }
 0x1db   : > { %v3908_v0 = vadd.f32 %v3907_v53, %v3828_v58  ;;  %v1726_v39 = vpop.f32.mrb[1].mxu1 }
 0x1dc   : > { %v3911_v21 = vadd.f32 %v3910_v7, %v1726_v39  ;;  %v3829_v54 = vpop.f32.mrb[2].mxu1 }
 0x1dd   : > { %v1774_v63 = vadd.f32 %v3908_v0, %v5265_v44  ;;  %v3914_v62 = vadd.f32 %v3913_v23, %v3829_v54  ;;  %v1729_v18 = vpop.f32.mrb[3].mxu1 }
 0x1de   : > { %v1772_v48 = vadd.f32 %v3911_v21, %v5265_v44  ;;  %v3917_v42 = vadd.f32 %v3916_v8, %v1729_v18 }
 0x1df   : > { %vm1782_vm2 = vcmp.gt.f32.partialorder %v1774_v63, 0.0  ;;  %v1790_v24 = vmul.f32 0.01, %v1774_v63  ;;  %v1775_v17 = vadd.f32 %v3914_v62, %v5265_v44 }
 0x1e0   : > { %vm1780_vm3 = vcmp.gt.f32.partialorder %v1772_v48, 0.0  ;;  %v1788_v35 = vmul.f32 0.01, %v1772_v48  ;;  %v1773_v26 = vadd.f32 %v3917_v42, %v5265_v44 }
 0x1e1   : > { %v5271_v60 = vsel %vm1782_vm2, %v1774_v63, %v1790_v24  ;;  %vm1783_vm4 = vcmp.gt.f32.partialorder %v1775_v17, 0.0  ;;  %v1791_v7 = vmul.f32 0.01, %v1775_v17 }
 0x1e2   : > { %v5273_v41 = vsel %vm1780_vm3, %v1772_v48, %v1788_v35  ;;  %vm1781_vm5 = vcmp.gt.f32.partialorder %v1773_v26, 0.0  ;;  %v1789_v53 = vmul.f32 0.01, %v1773_v26  ;;  %v3588_v23 = vpop.f32.mrb[44].mxu0  ;;  %v1846_v22 = vrot.slane %v5271_v60, 1 }
 0x1e3   : > { %v1804_v8 = vrot.slane %v5273_v41, 7  ;;  %v5277_v14 = vsel %vm1783_vm4, %v1775_v17, %v1791_v7  ;;  %v3589_v5 = vpop.f32.mrb[45].mxu0  ;;  %v1844_v33 = vrot.slane %v5273_v41, 1  ;;  %v1806_v36 = vrot.slane %v5271_v60, 7 }
 0x1e4   : > { %v1847_v27 = vrot.slane %v5277_v14, 1  ;;  %v5282_v58 = vsel %vm1781_vm5, %v1773_v26, %v1789_v53  ;;  %v3590_v0 = vadd.f32 %v3589_v5, %v3588_v23  ;;  %v3591_v39 = vpop.f32.mrb[46].mxu0  ;;  %v1933_v21 = vpack.c.bf16 %v5277_v14, %v5271_v60 }
 0x1e5   : > { %v1805_v54 = vrot.slane %v5282_v58, 7  ;;  %v3592_v63 = vpop.f32.mrb[47].mxu0  ;;  %v1932_v62 = vpack.c.bf16 %v5282_v58, %v5273_v41  ;;  %v1845_v18 = vrot.slane %v5282_v58, 1  ;;  %v1807_v48 = vrot.slane %v5277_v14, 7 }
 0x1e6   : > { %v3593_v42 = vadd.f32 %v3592_v63, %v3591_v39  ;;  %v3919_v24 = vadd.f32 %v5254_v6, %v3590_v0  ;;  %v1856_v17 = vsel %vm464_vm1, %v1846_v22, %v1847_v27  ;;  %v5298_v35 = vmul.f32 %v5273_v41, %v4830_v61 }
 0x1e7   : > { %2173 = vmatprep.mubr.bf16.mxu0 %v1932_v62  ;;  %v1857_v26 = vsel %vm464_vm1, %v1845_v18, %v1846_v22  ;;  %v5306_v7 = vsel %vm464_vm1, %v1844_v33, %v1845_v18  ;;  %v5309_v6 = vmul.f32 %v1856_v17, %v4782_v30  ;;  %v5315_v53 = vsel %vm343_vm0, %v1804_v8, %v1805_v54 }
 0x1e8   : > { %v3925_v61 = vadd.f32 %v5256_v13, %v3593_v42  ;;  %v5319_v23 = vmul.f32 %v1857_v26, %v5009_v49  ;;  %v1936_v22 = vmul.f32 %v5306_v7, %v4732_v10  ;;  %v1937_v5 = vmul.f32 %v1857_v26, %v4730_v9 }
 0x1e9   : > { %v5326_v30 = vmul.f32 %v5315_v53, %v4672_v56  ;;  %v5332_v0 = vsel %vm343_vm0, %v1806_v36, %v1807_v48  ;;  %v1817_v13 = vsel %vm343_vm0, %v1805_v54, %v1806_v36  ;;  %v5338_v49 = vmul.f32 %v5306_v7, %v4993_v3 }
 0x1ea   : > { %v3832_v10 = vpop.f32.mrb[4].mxu1  ;;  %v1944_v39 = vpack.c.bf16 %v1937_v5, %v1936_v22  ;;  %v5341_v9 = vmul.f32 %v1817_v13, %v4654_v51  ;;  %v5345_v56 = vmul.f32 %v5332_v0, %v4670_v55  ;;  %v5348_v63 = vmul.f32 %v1817_v13, %v5060_v40 }
 0x1eb   : > { %v3920_v62 = vadd.f32 %v3919_v24, %v3832_v10  ;;  %v1742_v18 = vpop.f32.mrb[5].mxu1  ;;  %v5351_v36 = vmul.f32 %v1856_v17, %v5007_v46  ;;  %v5355_v3 = vmul.f32 %v5282_v58, %v4866_v32  ;;  %v5359_v51 = vmul.f32 %v5271_v60, %v4864_v25 }
 0x1ec   : > { %v3923_v54 = vadd.f32 %v5258_v28, %v1742_v18  ;;  %v3833_v55 = vpop.f32.mrb[6].mxu1  ;;  %3850 = vmatprep.mubr.bf16.mxu1 %v1944_v39  ;;  %v1929_v40 = vpack.c.bf16 %v5345_v56, %v5341_v9  ;;  %v5365_v42 = vmul.f32 %v1857_v26, %v5127_v34  ;;  %v5368_v46 = vmul.f32 %v1856_v17, %v5125_v31  ;;  %v4138_v9 = vld [vmem:[%s6006_s4 + $0xa0] sm:$0xff]  }
 0x1ed   : > { %v1778_v32 = vadd.f32 %v3920_v62, %v5265_v44  ;;  %v3926_v24 = vadd.f32 %v3925_v61, %v3833_v55  ;;  %v1745_v22 = vpop.f32.mrb[7].mxu1  ;;  %v5381_v31 = vmul.f32 %v5315_v53, %v4892_v57  ;;  %v5385_v61 = vmul.f32 %v1817_v13, %v4890_v50  ;;  %v6100_v56 = vld [vmem:[#allocation17_spill] sm:$0xff] }
 0x1ee   : > { %v1776_v5 = vadd.f32 %v3923_v54, %v5265_v44  ;;  %v3929_v10 = vadd.f32 %v5260_v11, %v1745_v22  ;;  %v5390_v11 = vmul.f32 %v5277_v14, %v4964_v12 }
 0x1ef   : > { %vm1786_vm6 = vcmp.gt.f32.partialorder %v1778_v32, 0.0  ;;  %v1794_v17 = vmul.f32 0.01, %v1778_v32  ;;  %v1779_v26 = vadd.f32 %v3926_v24, %v5265_v44 }
 0x1f0   : > { %vm1784_vm7 = vcmp.gt.f32.partialorder %v1776_v5, 0.0  ;;  %v1792_v39 = vmul.f32 0.01, %v1776_v5  ;;  %v1777_v62 = vadd.f32 %v3929_v10, %v5265_v44  ;;  %6078 = vst [vmem:[#allocation38_spill] sm:$0xff] %v5390_v11  ;;  %v6094_v11 = vld [vmem:[#allocation29_spill] sm:$0xff] }
 0x1f1   : > { %v5392_v18 = vsel %vm1786_vm6, %v1778_v32, %v1794_v17  ;;  %vm1787_vm8 = vcmp.gt.f32.partialorder %v1779_v26, 0.0  ;;  %v1795_v57 = vmul.f32 0.01, %v1779_v26 }
 0x1f2   : > { %v5396_v55 = vsel %vm1784_vm7, %v1776_v5, %v1792_v39  ;;  %vm1785_vm9 = vcmp.gt.f32.partialorder %v1777_v62, 0.0  ;;  %v1793_v50 = vmul.f32 0.01, %v1777_v62  ;;  %v1850_v13 = vrot.slane %v5392_v18, 1 }
 0x1f3   : > { %v1848_v24 = vrot.slane %v5396_v55, 1  ;;  %v5400_v44 = vsel %vm1787_vm8, %v1779_v26, %v1795_v57  ;;  %v1808_v12 = vrot.slane %v5396_v55, 7  ;;  %v1810_v32 = vrot.slane %v5392_v18, 7 }
 0x1f4   : > { %v1811_v22 = vrot.slane %v5400_v44, 7  ;;  %v5405_v10 = vsel %vm1785_vm9, %v1777_v62, %v1793_v50  ;;  %v1851_v17 = vrot.slane %v5400_v44, 1 }
 0x1f5   : > { %v5414_v39 = vsel %vm464_vm1, %v1847_v27, %v1848_v24  ;;  %v1849_v26 = vrot.slane %v5405_v10, 1  ;;  %v1809_v54 = vrot.slane %v5405_v10, 7 }
 0x1f6   : > { %v1939_v62 = vmul.f32 %v5414_v39, %v4780_v29  ;;  %v5426_v50 = vsel %vm343_vm0, %v1811_v22, %v1804_v8  ;;  %v5430_v27 = vsel %vm464_vm1, %v1850_v13, %v1851_v17  ;;  %v5436_v34 = vsel %vm464_vm1, %v1851_v17, %v1844_v33  ;;  %v4128_v33 = vld [vmem:[%s6006_s4] sm:$0xff]  }
 0x1f7   : > { %v1920_v28 = vmul.f32 %v5426_v50, %v4656_v52  ;;  %v5442_v29 = vsel %vm464_vm1, %v1849_v26, %v1850_v13  ;;  %v1854_v8 = vsel %vm464_vm1, %v1848_v24, %v1849_v26  ;;  %v1942_v25 = vmul.f32 %v5430_v27, %v4947_v43  ;;  %v4129_v43 = vld [vmem:[%s6006_s4 + $0x88] sm:$0xff]  }
 0x1f8   : > { %v1945_v5 = vpack.c.bf16 %v1939_v62, %v5309_v6  ;;  %v1940_v17 = vmul.f32 %v1854_v8, %v4916_v19  ;;  %v1941_v52 = vmul.f32 %v5442_v29, %v4914_v16  ;;  %v5456_v13 = vmul.f32 %v1854_v8, %v5133_v59  ;;  %v4130_v59 = vld [vmem:[%s6006_s4 + $0x48] sm:$0xff]  }
 0x1f9   : > { %v1928_v57 = vpack.c.bf16 %v5326_v30, %v1920_v28  ;;  %v1943_v6 = vmul.f32 %v5436_v34, %v4945_v37  ;;  %v1860_v24 = vmul.f32 %v5436_v34, %v4995_v4  ;;  %v5468_v19 = vsel %vm343_vm0, %v1808_v12, %v1809_v54 }
 0x1fa   : > { %3851 = vmatmul.mubr.bf16.vlgmr.msra.gmra.mrb[8].mxu1 %v1945_v5  ;;  %v1946_v16 = vpack.c.bf16 %v1941_v52, %v1940_v17  ;;  %v5477_v30 = vsel %vm343_vm0, %v1807_v48, %v1808_v12  ;;  %v5481_v37 = vmul.f32 %v5468_v19, %v4694_v1  ;;  %v5485_v4 = vsel %vm343_vm0, %v1810_v32, %v1811_v22  ;;  %v4131_v1 = vld [vmem:[%s6006_s4 + $0x8] sm:$0xff]   ;;  %v6091_v17 = vld [vmem:[#allocation12_spill] sm:$0xff] }
 0x1fb   : > { %3859 = vmatpush3.bf16.msra.mxu1 %v5248_v20  ;;  %2174 = vmatmul.mubr.bf16.vlgmr.msra.gmra.mrb[48].mxu0 %v1928_v57  ;;  %v1947_v28 = vpack.c.bf16 %v1943_v6, %v1942_v25  ;;  %v1868_v5 = vpack.c.bf16 %v5338_v49, %v1860_v24  ;;  %v5491_v26 = vmul.f32 %v5477_v30, %v4696_v2  ;;  %v4132_v20 = vld [vmem:[%s6006_s4 + $0x90] sm:$0xff]   ;;  %v6082_v57 = vld [vmem:[#allocation6_spill] sm:$0xff] }
 0x1fc   : > { %3659 = vmatpush3.bf16.msra.mxu0 %v4128_v33  ;;  %2181 = vmatprep.mubr.bf16.mxu0 %v1933_v21  ;;  %v5504_v48 = vsel %vm343_vm0, %v1809_v54, %v1810_v32  ;;  %v5508_v2 = vmul.f32 %v5485_v4, %v4853_v38  ;;  %v5512_v49 = vmul.f32 %v5485_v4, %v4804_v45  ;;  %v4133_v21 = vld [vmem:[%s6006_s4 + $0x50] sm:$0xff]   ;;  %v6079_v54 = vld [vmem:[#allocation5_spill] sm:$0xff]  ;;  %v6080_v45 = vld [vmem:[#allocation22_spill] sm:$0xff] }
 0x1fd   : > { %3854 = vmatprep.mubr.bf16.mxu1 %v1946_v16  ;;  %3860 = vmatprep.subr.bf16.mxu1 %v4129_v43  ;;  %v5521_v15 = vmul.f32 %v5504_v48, %v4807_v47  ;;  %v5525_v38 = vmul.f32 %v5400_v44, %v6079_v54  ;;  %v5529_v12 = vmul.f32 %v5414_v39, %v6080_v45  ;;  %v6081_v32 = vld [vmem:[#allocation21_spill] sm:$0xff]  ;;  %v6083_v33 = vld [vmem:[#allocation24_spill] sm:$0xff]  ;;  %v6084_v6 = vld [vmem:[#allocation23_spill] sm:$0xff] }
 0x1fe   : > { %3660 = vmatprep.subr.bf16.mxu0 %v4130_v59  ;;  %v5532_v22 = vmul.f32 %v1854_v8, %v6081_v32  ;;  %v5536_v62 = vmul.f32 %v5426_v50, %v6082_v57  ;;  %v5540_v47 = vmul.f32 %v5442_v29, %v6083_v33  ;;  %v5548_v24 = vmul.f32 %v5430_v27, %v6084_v6  ;;  %v6085_v8 = vld [vmem:[#allocation7_spill] sm:$0xff]  ;;  %v6086_v45 = vld [vmem:[#allocation9_spill] sm:$0xff]  ;;  %v6087_v6 = vld [vmem:[#allocation8_spill] sm:$0xff] }
 0x1ff   : > { %3861 = vmatpush3.bf16.msra.mxu1 %v4129_v43  ;;  %v5552_v16 = vmul.f32 %v5396_v55, %v6085_v8  ;;  %v4134_v43 = vld [vmem:[%s6006_s4 + $0x10] sm:$0xff]   ;;  %v5563_v32 = vmul.f32 %v5332_v0, %v6086_v45  ;;  %v5574_v8 = vmul.f32 %v5477_v30, %v6087_v6  ;;  %v6089_v45 = vld [vmem:[#allocation10_spill] sm:$0xff]  ;;  %v6090_v57 = vld [vmem:[#allocation13_spill] sm:$0xff]  ;;  %v5593_v6 = vmul.f32 %v5504_v48, %v6091_v17 }
 0x200   : > { %3661 = vmatpush3.bf16.msra.mxu0 %v4131_v1  ;;  %3862 = vmatprep.subr.bf16.mxu1 %v4132_v20  ;;  %v4135_v1 = vld [vmem:[%s6006_s4 + $0x98] sm:$0xff]   ;;  %v6088_v54 = vld [vmem:[#allocation11_spill] sm:$0xff]  ;;  %v5585_v52 = vmul.f32 %v5392_v18, %v6089_v45  ;;  %v5589_v33 = vmul.f32 %v5468_v19, %v6090_v57  ;;  %v6093_v45 = vld [vmem:[#allocation14_spill] sm:$0xff]  ;;  %v5610_v17 = vmul.f32 %v5414_v39, %v6094_v11 }
 0x201   : > { %3662 = vmatprep.subr.bf16.mxu0 %v4133_v21  ;;  %v5578_v59 = vmul.f32 %v5405_v10, %v6088_v54  ;;  %v4136_v21 = vld [vmem:[%s6006_s4 + $0x58] sm:$0xff]   ;;  %v6092_v25 = vld [vmem:[#allocation15_spill] sm:$0xff]  ;;  %v5606_v57 = vmul.f32 %v5271_v60, %v6093_v45  ;;  %v6096_v39 = vpack.c.bf16 %v5405_v10, %v5396_v55 }
 0x202   : > { %3855 = vmatmul.mubr.bf16.gmra.mrb[12].mxu1 %v1947_v28  ;;  %v5597_v54 = vmul.f32 %v5282_v58, %v6092_v25  ;;  %v4137_v58 = vld [vmem:[%s6006_s4 + $0x18] sm:$0xff]   ;;  %v5650_v28 = vmul.f32 %v5396_v55, %v6100_v56  ;;  %v6105_v56 = vld [vmem:[#allocation26_spill] sm:$0xff] }
 0x203   : > { %3863 = vmatpush3.bf16.msra.mxu1 %v4132_v20  ;;  %2182 = vmatmul.mubr.bf16.gmra.mrb[52].mxu0 %v1929_v40  ;;  %v6095_v40 = vld [vmem:[#allocation35_spill] sm:$0xff]  ;;  %v6101_v20 = vld [vmem:[#allocation37_spill] sm:$0xff] }
 0x204   : > { %3663 = vmatpush3.bf16.msra.mxu0 %v4134_v43  ;;  %3874 = vmatprep.mubr.bf16.mxu1 %v1868_v5  ;;  %v5624_v11 = vmul.f32 %v5442_v29, %v6095_v40  ;;  %v4139_v5 = vld [vmem:[%s6006_s4 + $0x60] sm:$0xff]   ;;  %v6097_v43 = vld [vmem:[#allocation34_spill] sm:$0xff]  ;;  %v6098_v29 = vld [vmem:[#allocation16_spill] sm:$0xff]  ;;  %v5654_v25 = vmul.f32 %v5436_v34, %v6101_v20 }
 0x205   : > { %2189 = vmatprep.mubr.bf16.mxu0 %v6096_v39  ;;  %3864 = vmatprep.subr.bf16.mxu1 %v4135_v1  ;;  %v5638_v45 = vmul.f32 %v5430_v27, %v6097_v43  ;;  %v5642_v40 = vmul.f32 %v5315_v53, %v6098_v29  ;;  %v6099_v39 = vld [vmem:[#allocation18_spill] sm:$0xff]  ;;  %v6103_v43 = vld [vmem:[#allocation20_spill] sm:$0xff]  ;;  %v6104_v29 = vld [vmem:[#allocation19_spill] sm:$0xff] }
 0x206   : > { %3664 = vmatprep.subr.bf16.mxu0 %v4136_v21  ;;  %v5646_v60 = vmul.f32 %v5277_v14, %v6099_v39  ;;  %v6102_v21 = vld [vmem:[#allocation36_spill] sm:$0xff]  ;;  %v5664_v14 = vmul.f32 %v5332_v0, %v6103_v43  ;;  %v5668_v55 = vmul.f32 %v5477_v30, %v6104_v29  ;;  %v4140_v34 = vld [vmem:[%s6006_s4 + $0x20] sm:$0xff]   ;;  %v5679_v0 = vmul.f32 %v5405_v10, %v6105_v56  ;;  %v4141_v30 = vld [vmem:[%s6006_s4 + $0xa8] sm:$0xff]  }
 0x207   : > { %3865 = vmatpush3.bf16.msra.mxu1 %v4135_v1  ;;  %v5660_v53 = vmul.f32 %v5306_v7, %v6102_v21  ;;  %v6106_v21 = vld [vmem:[#allocation25_spill] sm:$0xff]  ;;  %v6107_v10 = vld [vmem:[#allocation28_spill] sm:$0xff]  ;;  %v6108_v29 = vld [vmem:[#allocation27_spill] sm:$0xff] }
 0x208   : > { %3665 = vmatpush3.bf16.msra.mxu0 %v4137_v58  ;;  %3866 = vmatprep.subr.bf16.mxu1 %v4138_v9  ;;  %v4142_v58 = vld [vmem:[%s6006_s4 + $0x68] sm:$0xff]   ;;  %v5693_v43 = vmul.f32 %v5392_v18, %v6106_v21  ;;  %v5701_v56 = vmul.f32 %v5504_v48, %v6108_v29  ;;  %v6109_v7 = vld [vmem:[#allocation31_spill] sm:$0xff]  ;;  %v6111_v39 = vld [vmem:[#allocation33_spill] sm:$0xff] }
 0x209   : > { %3666 = vmatprep.subr.bf16.mxu0 %v4139_v5  ;;  %v5697_v5 = vmul.f32 %v5468_v19, %v6107_v10  ;;  %v5705_v1 = vmul.f32 %v5400_v44, %v6109_v7  ;;  %v6110_v20 = vld [vmem:[#allocation30_spill] sm:$0xff]  ;;  %v5713_v21 = vmul.f32 %v5485_v4, %v6111_v39  ;;  %v6112_v19 = vpack.c.bf16 %v5481_v37, %v5491_v26  ;;  %v6113_v10 = vld [vmem:[#allocation32_spill] sm:$0xff]  ;;  %v4144_v37 = vld [vmem:[%s6006_s4 + $0xb0] sm:$0xff]  }
 0x20a   : > { %v5709_v27 = vmul.f32 %v5273_v41, %v6110_v20  ;;  %v2567_v48 = vpack.c.bf16 %v5693_v43, %v5679_v0  ;;  %v5722_v7 = vmul.f32 %v5426_v50, %v6113_v10  ;;  %v6114_v41 = vpack.c.bf16 %v5400_v44, %v5392_v18  ;;  %v4143_v4 = vld [vmem:[%s6006_s4 + $0x28] sm:$0xff]   ;;  %v4145_v18 = vld [vmem:[%s6006_s4 + $0x70] sm:$0xff]   ;;  %v4149_v39 = vld [vmem:[%s6006_s4 + $0x38] sm:$0xff]  }
 0x20b   : > { %3867 = vmatpush3.bf16.msra.mxu1 %v4138_v9  ;;  %2190 = vmatmul.mubr.bf16.gmra.mrb[56].mxu0 %v6112_v19  ;;  %v2555_v26 = vpack.c.bf16 %v5701_v56, %v5697_v5  ;;  %v4146_v9 = vld [vmem:[%s6006_s4 + $0x30] sm:$0xff]   ;;  %v6115_v20 = vpack.c.bf16 %v5512_v49, %v5521_v15  ;;  %v4150_v29 = vld [vmem:[%s6006_s4 + $0x200] sm:$0xff]   ;;  %v4154_v19 = vld [vmem:[%s6006_s4 + $0x1c8] sm:$0xff]   ;;  %v6118_v10 = vpack.c.bf16 %v5532_v22, %v5529_v12 }
 0x20c   : > { %3667 = vmatpush3.bf16.msra.mxu0 %v4140_v34  ;;  %2197 = vmatprep.mubr.bf16.mxu0 %v6114_v41  ;;  %v2568_v50 = vpack.c.bf16 %v5709_v27, %v5705_v1  ;;  %v2556_v44 = vpack.c.bf16 %v5722_v7, %v5713_v21  ;;  %v4147_v34 = vld [vmem:[%s6006_s4 + $0xb8] sm:$0xff]   ;;  %v4151_v49 = vld [vmem:[%s6006_s4 + $0x1c0] sm:$0xff]   ;;  %v6119_v41 = vpack.c.bf16 %v5536_v62, %v5508_v2  ;;  %v4157_v2 = vld [vmem:[%s6006_s4 + $0x1d0] sm:$0xff]  }
 0x20d   : > { %3868 = vmatprep.subr.bf16.mxu1 %v4141_v30  ;;  %3668 = vmatprep.subr.bf16.mxu0 %v4142_v58  ;;  %v4148_v58 = vld [vmem:[%s6006_s4 + $0x78] sm:$0xff]   ;;  %v4152_v15 = vld [vmem:[%s6006_s4 + $0x180] sm:$0xff]   ;;  %v6122_v62 = vpack.c.bf16 %v5368_v46, %v5365_v42  ;;  %v4165_v46 = vld [vmem:[%s6006_s4 + $0x228] sm:$0xff]  }
 0x20e   : > { %v4159_v12 = vld [vmem:[%s6006_s4 + $0x218] sm:$0xff]   ;;  %v4163_v42 = vld [vmem:[%s6006_s4 + $0x1e0] sm:$0xff]  }
 0x20f   : > { %3869 = vmatpush3.bf16.msra.mxu1 %v4141_v30  ;;  %v6116_v30 = vpack.c.bf16 %v5298_v35, %v5525_v38  ;;  %v4153_v35 = vld [vmem:[%s6006_s4 + $0x208] sm:$0xff]   ;;  %v6117_v38 = vpack.c.bf16 %v5351_v36, %v5319_v23  ;;  %v6120_v23 = vpack.c.bf16 %v5359_v51, %v5355_v3  ;;  %v4158_v3 = vld [vmem:[%s6006_s4 + $0x190] sm:$0xff]   ;;  %v6121_v51 = vpack.c.bf16 %v5548_v24, %v5540_v47  ;;  %v4160_v22 = vld [vmem:[%s6006_s4 + $0x1d8] sm:$0xff]  }
 0x210   : > { %3669 = vmatpush3.bf16.msra.mxu0 %v4143_v4  ;;  %3870 = vmatprep.subr.bf16.mxu1 %v4144_v37  ;;  %v4156_v4 = vld [vmem:[%s6006_s4 + $0x210] sm:$0xff]   ;;  %v4155_v36 = vld [vmem:[%s6006_s4 + $0x188] sm:$0xff]   ;;  %v4162_v47 = vld [vmem:[%s6006_s4 + $0x220] sm:$0xff]  }
 0x211   : > { %3670 = vmatprep.subr.bf16.mxu0 %v4145_v18  ;;  %v6124_v24 = vld [vmem:[#allocation38_spill] sm:$0xff] }
 0x212   : > { %v6125_v18 = vpack.c.bf16 %v5552_v16, %v6124_v24  ;;  %v6126_v16 = vpack.c.bf16 %v5574_v8, %v5563_v32  ;;  %v4169_v32 = vld [vmem:[%s6006_s4 + $0x1f0] sm:$0xff]   ;;  %v4171_v8 = vld [vmem:[%s6006_s4 + $0x238] sm:$0xff]  }
 0x213   : > { %3871 = vmatpush3.bf16.msra.mxu1 %v4144_v37  ;;  %2198 = vmatmul.mubr.bf16.gmra.mrb[60].mxu0 %v6115_v20  ;;  %v6123_v37 = vpack.c.bf16 %v5385_v61, %v5381_v31  ;;  %v4164_v31 = vld [vmem:[%s6006_s4 + $0x1a0] sm:$0xff]   ;;  %v4166_v61 = vld [vmem:[%s6006_s4 + $0x1e8] sm:$0xff]  }
 0x214   : > { %3671 = vmatpush3.bf16.msra.mxu0 %v4146_v9  ;;  %2447 = vmatprep.mubr.bf16.mxu0 %v6116_v30  ;;  %v4161_v9 = vld [vmem:[%s6006_s4 + $0x198] sm:$0xff]   ;;  %v4167_v20 = vld [vmem:[%s6006_s4 + $0x1a8] sm:$0xff]   ;;  %v6128_v30 = vpack.c.bf16 %v5593_v6, %v5589_v33  ;;  %v6131_v33 = vpack.c.bf16 %v5638_v45, %v5624_v11  ;;  %v6132_v6 = vpack.c.bf16 %v5348_v63, %v5642_v40 }
 0x215   : > { %3872 = vmatprep.subr.bf16.mxu1 %v4147_v34  ;;  %3672 = vmatprep.subr.bf16.mxu0 %v4148_v58  ;;  %v6127_v58 = vpack.c.bf16 %v5585_v52, %v5578_v59  ;;  %v4170_v52 = vld [vmem:[%s6006_s4 + $0x1b0] sm:$0xff]   ;;  %v4172_v59 = vld [vmem:[%s6006_s4 + $0x1f8] sm:$0xff]  }
 0x217   : > { %3873 = vmatpush3.bf16.msra.mxu1 %v4147_v34  ;;  %v4168_v34 = vld [vmem:[%s6006_s4 + $0x230] sm:$0xff]  }
 0x218   : > { %3673 = vmatpush3.bf16.msra.mxu0 %v4149_v39  ;;  %3882 = vmatprep.subr.bf16.mxu1 %v4150_v29  ;;  %v6129_v39 = vpack.c.bf16 %v5606_v57, %v5597_v54  ;;  %v6133_v54 = vpack.c.bf16 %v5650_v28, %v5646_v60  ;;  %v6134_v57 = vpack.c.bf16 %v5660_v53, %v5654_v25 }
 0x219   : > { %3710 = vmatprep.subr.bf16.mxu0 %v4151_v49  ;;  %v6130_v49 = vpack.c.bf16 %v5456_v13, %v5610_v17  ;;  %v6135_v13 = vpack.c.bf16 %v5668_v55, %v5664_v14 }
 0x21a   : > { %3875 = vmatmul.mubr.bf16.vlgmr.msra.gmra.mrb[8].mxu1 %v6117_v38 }
 0x21b   : > { %3878 = vmatprep.mubr.bf16.mxu1 %v6118_v10  ;;  %3883 = vmatpush3.bf16.msra.mxu1 %v4150_v29  ;;  %v4173_v29 = vld [vmem:[%s6006_s4 + $0x1b8] sm:$0xff]  }
 0x21c   : > { %2448 = vmatmul.mubr.bf16.vlgmr.msra.gmra.mrb[64].mxu0 %v6119_v41  ;;  %3884 = vmatprep.subr.bf16.mxu1 %v4153_v35 }
 0x21d   : > { %3711 = vmatpush3.bf16.msra.mxu0 %v4152_v15  ;;  %2455 = vmatprep.mubr.bf16.mxu0 %v6120_v23 }
 0x21e   : > { %3712 = vmatprep.subr.bf16.mxu0 %v4154_v19 }
 0x21f   : > { %3885 = vmatpush3.bf16.msra.mxu1 %v4153_v35 }
 0x220   : > { %3886 = vmatprep.subr.bf16.mxu1 %v4156_v4 }
 0x221   : > { %3713 = vmatpush3.bf16.msra.mxu0 %v4155_v36 }
 0x222   : > { %3879 = vmatmul.mubr.bf16.gmra.mrb[12].mxu1 %v6121_v51  ;;  %3714 = vmatprep.subr.bf16.mxu0 %v4157_v2 }
 0x223   : > { %3887 = vmatpush3.bf16.msra.mxu1 %v4156_v4  ;;  %3898 = vmatprep.mubr.bf16.mxu1 %v6122_v62 }
 0x224   : > { %2456 = vmatmul.mubr.bf16.gmra.mrb[68].mxu0 %v6123_v37  ;;  %3888 = vmatprep.subr.bf16.mxu1 %v4159_v12 }
 0x225   : > { %3715 = vmatpush3.bf16.msra.mxu0 %v4158_v3  ;;  %2463 = vmatprep.mubr.bf16.mxu0 %v6125_v18 }
 0x226   : > { %3716 = vmatprep.subr.bf16.mxu0 %v4160_v22 }
 0x227   : > { %3889 = vmatpush3.bf16.msra.mxu1 %v4159_v12 }
 0x228   : > { %3890 = vmatprep.subr.bf16.mxu1 %v4162_v47 }
 0x229   : > { %3717 = vmatpush3.bf16.msra.mxu0 %v4161_v9 }
 0x22a   : > { %3718 = vmatprep.subr.bf16.mxu0 %v4163_v42 }
 0x22b   : > { %3891 = vmatpush3.bf16.msra.mxu1 %v4162_v47 }
 0x22c   : > { %2464 = vmatmul.mubr.bf16.gmra.mrb[72].mxu0 %v6126_v16  ;;  %3892 = vmatprep.subr.bf16.mxu1 %v4165_v46 }
 0x22d   : > { %3719 = vmatpush3.bf16.msra.mxu0 %v4164_v31  ;;  %2471 = vmatprep.mubr.bf16.mxu0 %v6127_v58 }
 0x22e   : > { %3720 = vmatprep.subr.bf16.mxu0 %v4166_v61 }
 0x22f   : > { %3893 = vmatpush3.bf16.msra.mxu1 %v4165_v46 }
 0x230   : > { %3894 = vmatprep.subr.bf16.mxu1 %v4168_v34 }
 0x231   : > { %3721 = vmatpush3.bf16.msra.mxu0 %v4167_v20 }
 0x232   : > { %3722 = vmatprep.subr.bf16.mxu0 %v4169_v32 }
 0x233   : > { %3895 = vmatpush3.bf16.msra.mxu1 %v4168_v34 }
 0x234   : > { %2472 = vmatmul.mubr.bf16.gmra.mrb[76].mxu0 %v6128_v30  ;;  %3896 = vmatprep.subr.bf16.mxu1 %v4171_v8 }
 0x235   : > { %3723 = vmatpush3.bf16.msra.mxu0 %v4170_v52  ;;  %2806 = vmatprep.mubr.bf16.mxu0 %v6129_v39 }
 0x236   : > { %3724 = vmatprep.subr.bf16.mxu0 %v4172_v59 }
 0x237   : > { %3897 = vmatpush3.bf16.msra.mxu1 %v4171_v8 }
 0x239   : > { %3725 = vmatpush3.bf16.msra.mxu0 %v4173_v29 }
 0x23a   : > { %3899 = vmatmul.mubr.bf16.vlgmr.msra.gmra.mrb[8].mxu1 %v6130_v49 }
 0x23b   : > { %3902 = vmatprep.mubr.bf16.mxu1 %v6131_v33 }
 0x23c   : > { %2807 = vmatmul.mubr.bf16.vlgmr.msra.gmra.mrb[80].mxu0 %v6132_v6 }
 0x23d   : > { %2814 = vmatprep.mubr.bf16.mxu0 %v6133_v54 }
 0x242   : > { %3903 = vmatmul.mubr.bf16.gmra.mrb[12].mxu1 %v6134_v57 }
 0x244   : > { %2815 = vmatmul.mubr.bf16.gmra.mrb[84].mxu0 %v6135_v13 }
 0x245   : > { %2822 = vmatprep.mubr.bf16.mxu0 %v2567_v48 }
 0x24c   : > { %2823 = vmatmul.mubr.bf16.gmra.mrb[88].mxu0 %v2555_v26 }
 0x24d   : > { %2830 = vmatprep.mubr.bf16.mxu0 %v2568_v50 }
 0x254   : > { %2831 = vmatmul.mubr.bf16.gmra.mrb[92].mxu0 %v2556_v44 }
 0x2ce   : > { %v3622_v63 = vpop.f32.mrb[48].mxu0 }
 0x2cf   : > { %v3623_v28 = vpop.f32.mrb[49].mxu0 }
 0x2d0   : > { %v3624_v17 = vadd.f32 %v3623_v28, %v3622_v63  ;;  %v3625_v60 = vpop.f32.mrb[50].mxu0 }
 0x2d1   : > { %v3626_v11 = vpop.f32.mrb[51].mxu0 }
 0x2d2   : > { %v3627_v25 = vadd.f32 %v3626_v11, %v3625_v60  ;;  %v5909_v60 = vld [vmem:[%s6007_s5] ss:$0 sm:$0xff] }
 0x2d6   : > { %v3628_v45 = vpop.f32.mrb[52].mxu0 }
 0x2d7   : > { %v3629_v40 = vpop.f32.mrb[53].mxu0 }
 0x2d8   : > { %v3630_v53 = vadd.f32 %v3629_v40, %v3628_v45  ;;  %v3631_v14 = vpop.f32.mrb[54].mxu0 }
 0x2d9   : > { %v3632_v55 = vpop.f32.mrb[55].mxu0 }
 0x2da   : > { %v3633_v0 = vadd.f32 %v3632_v55, %v3631_v14 }
 0x2de   : > { %v3634_v43 = vpop.f32.mrb[56].mxu0 }
 0x2df   : > { %v3635_v5 = vpop.f32.mrb[57].mxu0 }
 0x2e0   : > { %v3636_v27 = vadd.f32 %v3635_v5, %v3634_v43  ;;  %v3637_v1 = vpop.f32.mrb[58].mxu0 }
 0x2e1   : > { %v3638_v56 = vpop.f32.mrb[59].mxu0 }
 0x2e2   : > { %v3639_v48 = vadd.f32 %v3638_v56, %v3637_v1 }
 0x2e6   : > { %v3640_v21 = vpop.f32.mrb[60].mxu0 }
 0x2e7   : > { %v3641_v7 = vpop.f32.mrb[61].mxu0 }
 0x2e8   : > { %v3642_v26 = vadd.f32 %v3641_v7, %v3640_v21  ;;  %v3643_v50 = vpop.f32.mrb[62].mxu0 }
 0x2e9   : > { %v3644_v44 = vpop.f32.mrb[63].mxu0 }
 0x2ea   : > { %v3645_v35 = vadd.f32 %v3644_v44, %v3643_v50  ;;  %v4178_v50 = vld [vmem:[%s4439_s20 + $0x8] sm:$0xff] }
 0x2ef   : > { %v3674_v15 = vpop.f32.mrb[64].mxu0 }
 0x2f0   : > { %v3675_v38 = vpop.f32.mrb[65].mxu0 }
 0x2f1   : > { %v3676_v19 = vadd.f32 %v3675_v38, %v3674_v15  ;;  %v3677_v10 = vpop.f32.mrb[66].mxu0 }
 0x2f2   : > { %v3678_v41 = vpop.f32.mrb[67].mxu0 }
 0x2f3   : > { %v3933_v4 = vadd.f32 %v3676_v19, %v3624_v17  ;;  %v3679_v23 = vadd.f32 %v3678_v41, %v3677_v10 }
 0x2f5   : > { %v3939_v36 = vadd.f32 %v3679_v23, %v3627_v25 }
 0x2f7   : > { %v3680_v2 = vpop.f32.mrb[68].mxu0 }
 0x2f8   : > { %v3681_v12 = vpop.f32.mrb[69].mxu0 }
 0x2f9   : > { %v3682_v3 = vadd.f32 %v3681_v12, %v3680_v2  ;;  %v3683_v51 = vpop.f32.mrb[70].mxu0 }
 0x2fa   : > { %v3684_v22 = vpop.f32.mrb[71].mxu0 }
 0x2fb   : > { %v3930_v62 = vadd.f32 %v3682_v3, %v3630_v53  ;;  %v3685_v37 = vadd.f32 %v3684_v22, %v3683_v51  ;;  %v4179_v3 = vld [vmem:[%s4439_s20 + $0x10] sm:$0xff] }
 0x2fd   : > { %v3936_v47 = vadd.f32 %v3685_v37, %v3633_v0 }
 0x2ff   : > { %v3686_v24 = vpop.f32.mrb[72].mxu0 }
 0x300   : > { %v3687_v18 = vpop.f32.mrb[73].mxu0 }
 0x301   : > { %v3688_v9 = vadd.f32 %v3687_v18, %v3686_v24  ;;  %v3689_v42 = vpop.f32.mrb[74].mxu0 }
 0x302   : > { %v3690_v46 = vpop.f32.mrb[75].mxu0 }
 0x303   : > { %v5898_v31 = vadd.f32 %v3688_v9, %v3636_v27  ;;  %v3691_v61 = vadd.f32 %v3690_v46, %v3689_v42  ;;  %v4177_v27 = vld [vmem:[%s4439_s20] sm:$0xff]  ;;  %v4180_v42 = vld [vmem:[%s4439_s20 + $0x18] sm:$0xff] }
 0x305   : > { %v5900_v16 = vadd.f32 %v3691_v61, %v3639_v48 }
 0x307   : > { %v3692_v34 = vpop.f32.mrb[76].mxu0 }
 0x308   : > { %v3693_v58 = vpop.f32.mrb[77].mxu0 }
 0x309   : > { %v3694_v20 = vadd.f32 %v3693_v58, %v3692_v34  ;;  %v3695_v32 = vpop.f32.mrb[78].mxu0 }
 0x30a   : > { %v3696_v8 = vpop.f32.mrb[79].mxu0 }
 0x30b   : > { %v5902_v52 = vadd.f32 %v3694_v20, %v3642_v26  ;;  %v3697_v59 = vadd.f32 %v3696_v8, %v3695_v32 }
 0x30d   : > { %v5904_v30 = vadd.f32 %v3697_v59, %v3645_v35  ;;  %v3900_v39 = vpop.f32.mrb[8].mxu1 }
 0x30e   : > { %v2873_v29 = vpop.f32.mrb[9].mxu1 }
 0x30f   : > { %v3726_v49 = vpop.f32.mrb[80].mxu0  ;;  %v3901_v33 = vpop.f32.mrb[10].mxu1 }
 0x310   : > { %v3727_v6 = vpop.f32.mrb[81].mxu0  ;;  %v2876_v54 = vpop.f32.mrb[11].mxu1 }
 0x311   : > { %v3728_v57 = vadd.f32 %v3727_v6, %v3726_v49  ;;  %v3729_v13 = vpop.f32.mrb[82].mxu0 }
 0x312   : > { %v3730_v63 = vpop.f32.mrb[83].mxu0 }
 0x313   : > { %v3934_v28 = vadd.f32 %v3933_v4, %v3728_v57  ;;  %v3731_v17 = vadd.f32 %v3730_v63, %v3729_v13  ;;  %v4182_v13 = vld [vmem:[%s4439_s20 + $0x28] sm:$0xff] }
 0x315   : > { %v3935_v11 = vadd.f32 %v3934_v28, %v2873_v29  ;;  %v3940_v25 = vadd.f32 %v3939_v36, %v3731_v17  ;;  %v5912_v45 = vpop.f32.mrb[12].mxu1 }
 0x316   : > { %v2889_v40 = vpop.f32.mrb[13].mxu1 }
 0x317   : > { %v2919_v53 = vadd.f32 %v3935_v11, %v5909_v60  ;;  %v3941_v14 = vadd.f32 %v3940_v25, %v2876_v54  ;;  %v3732_v55 = vpop.f32.mrb[84].mxu0  ;;  %v5915_v0 = vpop.f32.mrb[14].mxu1 }
 0x318   : > { %v3733_v43 = vpop.f32.mrb[85].mxu0  ;;  %v2892_v5 = vpop.f32.mrb[15].mxu1 }
 0x319   : > { %v2927_v1 = vadd.f32 %v4177_v27, %v2919_v53  ;;  %v2920_v56 = vadd.f32 %v3941_v14, %v5909_v60  ;;  %v3734_v48 = vadd.f32 %v3733_v43, %v3732_v55  ;;  %v3735_v21 = vpop.f32.mrb[86].mxu0 }
 0x31a   : > { %v3736_v7 = vpop.f32.mrb[87].mxu0 }
 0x31b   : > { %vm2935_vm10 = vcmp.gt.f32.partialorder %v2927_v1, 0.0  ;;  %v2943_v26 = vmul.f32 0.01, %v2927_v1  ;;  %v2928_v44 = vadd.f32 %v4178_v50, %v2920_v56  ;;  %v3931_v35 = vadd.f32 %v3930_v62, %v3734_v48 }
 0x31c   : > { %v3737_v15 = vadd.f32 %v3736_v7, %v3735_v21 }
 0x31d   : > { %v2951_v38 = vsel %vm2935_vm10, %v2927_v1, %v2943_v26  ;;  %vm2936_vm11 = vcmp.gt.f32.partialorder %v2928_v44, 0.0  ;;  %v2944_v19 = vmul.f32 0.01, %v2928_v44  ;;  %v3932_v10 = vadd.f32 %v3931_v35, %v3900_v39 }
 0x31e   : > { %2959 = vst [vmem:[%s5922_s14] sm:$0xff] %v2951_v38  ;;  %v3937_v41 = vadd.f32 %v3936_v47, %v3737_v15 }
 0x31f   : > { %v2952_v4 = vsel %vm2936_vm11, %v2928_v44, %v2944_v19  ;;  %v2921_v23 = vadd.f32 %v3932_v10, %v5909_v60  ;;  %v3738_v36 = vpop.f32.mrb[88].mxu0 }
 0x320   : > { %2960 = vst [vmem:[%s5922_s14 + $0x8] sm:$0xff] %v2952_v4  ;;  %v3938_v2 = vadd.f32 %v3937_v41, %v3901_v33  ;;  %v3739_v12 = vpop.f32.mrb[89].mxu0 }
 0x321   : > { %v2929_v51 = vadd.f32 %v4179_v3, %v2921_v23  ;;  %v3740_v22 = vadd.f32 %v3739_v12, %v3738_v36  ;;  %v3741_v62 = vpop.f32.mrb[90].mxu0 }
 0x322   : > { %v2922_v37 = vadd.f32 %v3938_v2, %v5909_v60  ;;  %v3742_v24 = vpop.f32.mrb[91].mxu0 }
 0x323   : > { %vm2937_vm12 = vcmp.gt.f32.partialorder %v2929_v51, 0.0  ;;  %v2945_v18 = vmul.f32 0.01, %v2929_v51  ;;  %v3946_v47 = vadd.f32 %v5898_v31, %v3740_v22  ;;  %v3743_v9 = vadd.f32 %v3742_v24, %v3741_v62  ;;  %v4181_v31 = vld [vmem:[%s4439_s20 + $0x20] sm:$0xff] }
 0x324   : > { %v2930_v46 = vadd.f32 %v4180_v42, %v2922_v37 }
 0x325   : > { %v2953_v61 = vsel %vm2937_vm12, %v2929_v51, %v2945_v18  ;;  %v3947_v34 = vadd.f32 %v3946_v47, %v2889_v40  ;;  %v3952_v58 = vadd.f32 %v5900_v16, %v3743_v9 }
 0x326   : > { %2961 = vst [vmem:[%s5922_s14 + $0x10] sm:$0xff] %v2953_v61  ;;  %vm2938_vm13 = vcmp.gt.f32.partialorder %v2930_v46, 0.0  ;;  %v2946_v20 = vmul.f32 0.01, %v2930_v46 }
 0x327   : > { %v2923_v32 = vadd.f32 %v3947_v34, %v5909_v60  ;;  %v3953_v8 = vadd.f32 %v3952_v58, %v2892_v5  ;;  %v3744_v59 = vpop.f32.mrb[92].mxu0 }
 0x328   : > { %v2954_v39 = vsel %vm2938_vm13, %v2930_v46, %v2946_v20  ;;  %v3745_v29 = vpop.f32.mrb[93].mxu0 }
 0x329   : > { %2962 = vst [vmem:[%s5922_s14 + $0x18] sm:$0xff] %v2954_v39  ;;  %v2931_v49 = vadd.f32 %v4181_v31, %v2923_v32  ;;  %v2924_v33 = vadd.f32 %v3953_v8, %v5909_v60  ;;  %v3746_v6 = vadd.f32 %v3745_v29, %v3744_v59  ;;  %v3747_v54 = vpop.f32.mrb[94].mxu0 }
 0x32a   : > { %v3748_v16 = vpop.f32.mrb[95].mxu0 }
 0x32b   : > { %vm2939_vm14 = vcmp.gt.f32.partialorder %v2931_v49, 0.0  ;;  %v2947_v57 = vmul.f32 0.01, %v2931_v49  ;;  %v2932_v63 = vadd.f32 %v4182_v13, %v2924_v33  ;;  %v3943_v28 = vadd.f32 %v5902_v52, %v3746_v6  ;;  %v4183_v52 = vld [vmem:[%s4439_s20 + $0x30] sm:$0xff] }
 0x32c   : > { %v3749_v17 = vadd.f32 %v3748_v16, %v3747_v54 }
 0x32d   : > { %v2955_v11 = vsel %vm2939_vm14, %v2931_v49, %v2947_v57  ;;  %vm2940_vm15 = vcmp.gt.f32.partialorder %v2932_v63, 0.0  ;;  %v2948_v25 = vmul.f32 0.01, %v2932_v63  ;;  %v3944_v40 = vadd.f32 %v3943_v28, %v5912_v45  ;;  %v4184_v45 = vld [vmem:[%s4439_s20 + $0x38] sm:$0xff]  ;;  %s4185_s20 = scalar_lea.vmem %s5956_s15, 1024 }
 0x32e   : > { %2963 = vst [vmem:[%s5922_s14 + $0x20] sm:$0xff] %v2955_v11  ;;  %v3949_v53 = vadd.f32 %v5904_v30, %v3749_v17  ;;  %p4186_p11 = scmp.ne.s32.totalorder %s5956_s15, %s4185_s20  ;;  %p4193_p1 = scmp.lt.s32.totalorder %s4191_s26, %s4185_s20 }
 0x32f   : > { %v2956_v14 = vsel %vm2940_vm15, %v2932_v63, %v2948_v25  ;;  %v2925_v55 = vadd.f32 %v3944_v40, %v5909_v60 }
 0x330   : > { %2964 = vst [vmem:[%s5922_s14 + $0x28] sm:$0xff] %v2956_v14  ;;  %v3950_v43 = vadd.f32 %v3949_v53, %v5915_v0  ;;  %p4187_p12 = pnand %p4186_p11, %p4326_p5  ;;  %p4194_p2 = por %p4193_p1, %p4192_p0 }
 0x331   : > { %v2933_v5 = vadd.f32 %v4183_v52, %v2925_v55 }
 0x332   : > { %v2926_v27 = vadd.f32 %v3950_v43, %v5909_v60  ;;  %p4188_p13 = pneg %p4187_p12 }
 0x333   : > { %vm2941_vm0 = vcmp.gt.f32.partialorder %v2933_v5, 0.0  ;;  %v2949_v1 = vmul.f32 0.01, %v2933_v5 }
 0x334   : > { %v2934_v56 = vadd.f32 %v4184_v45, %v2926_v27  ;;  %p4195_p3 = pnand %p4194_p2, %p4188_p13 }
 0x335   : > { %v2957_v30 = vsel %vm2941_vm0, %v2933_v5, %v2949_v1 }
 0x336   : > { %2965 = vst [vmem:[%s5922_s14 + $0x30] sm:$0xff] %v2957_v30  ;;  %vm2942_vm1 = vcmp.gt.f32.partialorder %v2934_v56, 0.0  ;;  %v2950_v48 = vmul.f32 0.01, %v2934_v56 }
 0x338   : > { %v2958_v60 = vsel %vm2942_vm1, %v2934_v56, %v2950_v48 }
 0x339   : > { %2966 = vst [vmem:[%s5922_s14 + $0x38] sm:$0xff] %v2958_v60 }
 0x33a   : > { %4198 = shalt.err (!%p4195_p3)
}
 0x33b   : > { %s4199_s28 = scalar_lea.hbm %s5954_s18, 1024  ;;  %s4203_s12 = scalar_lea.hbm %s6008_s6, 2048 }
 0x33c   : > { %p4200_p4 = scmp.ne.s32.totalorder %s5954_s18, %s4199_s28  ;;  %p4204_p9 = scmp.lt.u32.totalorder %s5954_s18, %s6008_s6 }
 0x33d   : > { %p4205_p10 = scmp.lt.u32.totalorder %s4203_s12, %s4199_s28  ;;  %p4207_p12 = scmp.lt.u32.totalorder %s4199_s28, %s5954_s18 }
 0x33e   : > { %p4201_p7 = pnand %p4200_p4, %p4326_p5 }
 0x33f   : > { %p4206_p11 = por %p4205_p10, %p4204_p9 }
 0x340   : > { %p4202_p8 = pneg %p4201_p7 }
 0x341   : > { %p4208_p13 = por %p4207_p12, %p4206_p11 }
 0x343   : > { %p4209_p0 = pnand %p4208_p13, %p4202_p8 }
 0x345   : > { %4212 = shalt.err (!%p4209_p0)
}
 0x346   : > { %s4251_s10 = smov 128   ;;  %s4252_s16 = smov 8  }
 0x347   : > { %3986 = dma.vmem_to_hbm [thread:$0]  (%p4326_p5), %s5956_s15, 1024, %s5954_s18, %s5961_s25, %s4251_s10, %s4251_s10, %s4252_s16  }
 0x348 PF: > { %p3992_p1 = scmp.ge.s32.totalorder %s4247_s24, 2  ;;  %s2996_s17 = sand.u32 1, %s4235_s21  }
 0x349   : > { %s2997_s20 = scalar_lea.sflag [#allocation3], %s2996_s17 }
 0x34a   : > { %p3989_p2 = pnand %p3992_p1, %p4330_p6 }
 0x34c   : > { %4230 = dma.done.wait (!%p3989_p2), %s2997_s20, 1024  }
 0x34d   : > { %4232 = vsyncadd (!%p3989_p2), %s2997_s20, 4294966272  ;;  %p16_p3 = scmp.ge.s32.totalorder %s4313_s27, 4   ;;  %s6136_s21 = smov %s4239_s22 }
 0x34e   : > { %s6137_s22 = smov %s4243_s23  ;;  %s6138_s23 = smov %s4324_s30 }
 0x34f   : > { %s6139_s24 = smov %s4313_s27  ;;  %18 = sbr.rel (!%p16_p3) target bundleno = 3 (0x3), region = 90 }
 0x356   :  { %3002 = vsyncpa [#allocation3], 1 }
 0x357   :  { %3004 = vsyncpa [#allocation3 + $0x1], 1 }

</bundles_post_ra>
